<compile_context>
chip_gen: v7x
topology: tpu7x:2x2x1
jax: 0.10.0
libtpu: 0.0.40
codegen_flags: <defaults>
</compile_context>

<pallas_src>
import numpy as np
import jax
import jax.numpy as jnp
from jax.experimental import pallas as pl
from jax.experimental.pallas import tpu as pltpu


# ---------------------------------------------------------------------------
# Host-side folding helpers (pure constant-matrix construction / glue)
# ---------------------------------------------------------------------------

CONV_DEFS = [(3, 1), (3, 2), (3, 3), (1, 1)]   # (kernel, dilation), stride = 4


def adaptive_pool_matrix(L_in, L_out):
    """P[j, i] such that (P @ x) == torch.nn.AdaptiveAvgPool1d(L_out) over length L_in."""
    P = np.zeros((L_out, L_in), dtype=np.float32)
    for j in range(L_out):
        s = (j * L_in) // L_out
        e = -((-(j + 1) * L_in) // L_out)      # ceil((j+1)*L_in/L_out)
        P[j, s:e] = 1.0 / (e - s)
    return P


def conv_out_len(S, k, d, stride=4):
    return (S - d * (k - 1) - 1) // stride + 1


def build_constants(params, shot_num, shot_channel, input_channel, overlap_ratio, seq_len):
    """Fold overlapSeqGenerate / poolings / convs / all biases / mergePooling into constants."""
    S, IC = shot_channel, input_channel
    n_shots = [shot_num, int(shot_num * 1.5), int(shot_num * 0.5)]
    rows = sum(n_shots)
    rp = max(8, -(-rows // 8) * 8)             # pad rows to a sublane multiple (aligned slices)
    row_off = np.concatenate([[0], np.cumsum(n_shots)]).astype(np.int64)

    # --- overlapSeqGenerate as a selection matrix, fused with the 3 adaptive shot poolings ---
    sc = seq_len // shot_num
    of = max(int(overlap_ratio * sc), 1)
    idx = []
    for i in range(shot_num):
        if i == 0:
            idx += list(range(seq_len - of, seq_len))
        else:
            idx += list(range(i * sc - of, i * sc))
        idx += list(range(i * sc, (i + 1) * sc))
    idx += list(range(sc * shot_num, seq_len))
    L_ov = len(idx)
    Sel = np.zeros((L_ov, seq_len), np.float32)
    Sel[np.arange(L_ov), np.asarray(idx)] = 1.0
    P_all = np.concatenate([adaptive_pool_matrix(L_ov, n) for n in n_shots], axis=0)
    P_ov = (P_all @ Sel).astype(np.float32)                       # [rows, seq_len]

    # --- conv taps + concat + AdaptiveAvgPool1d(S), pre-multiplied by fc_up weight ---
    w_up = np.asarray(params["w_up"], np.float32)                 # [IC, S]
    b_up = np.asarray(params["b_up"], np.float32)                 # [S]
    Ls = [conv_out_len(S, k, d) for (k, d) in CONV_DEFS]
    L_total = sum(Ls)
    P2 = adaptive_pool_matrix(L_total, S)                         # [S, L_total]
    n_taps = sum(k for (k, _) in CONV_DEFS)

    WR_list, brow_list, q_list = [], [], []
    Wbd = np.zeros((n_taps, rows, rows), np.float32)
    ti, offset = 0, 0
    for ci, ((k, d), L) in enumerate(zip(CONV_DEFS, Ls)):
        q_list.append(P2[:, offset:offset + L].sum(axis=1))       # [S]
        for t in range(k):
            R = np.zeros((S, S), np.float32)                      # shared across branches
            for l in range(L):
                R[4 * l + t * d, :] += P2[:, offset + l]
            WR_list.append(w_up @ R)                              # [IC, S]
            brow_list.append(b_up @ R)                            # [S]
            for bi in range(3):                                   # block-diag channel mix
                Wc = np.asarray(params["convs"][bi][ci][2], np.float32)   # [C, C, k]
                r0, C = int(row_off[bi]), n_shots[bi]
                Wbd[ti, r0:r0 + C, r0:r0 + C] = Wc[:, :, t]
            ti += 1
        offset += L
    assert offset == L_total and ti == n_taps

    # (a) per-tap left factors Wbd[t] @ P_ov, zero-padded to rp rows, stacked -> [T*rp, seq_len]
    WbdP = np.zeros((n_taps * rp, seq_len), np.float32)
    for t in range(n_taps):
        WbdP[t * rp:t * rp + rows, :] = Wbd[t] @ P_ov
    # (b) right factors stacked vertically -> [T*IC, S]
    WR_v = np.concatenate(WR_list, axis=0)                        # [T*IC, S]
    # (c) fc_up-bias contribution, folded to a per-row pooled bias (then into bias2 below)
    pool_brow = np.zeros((rows, S), np.float32)
    for t in range(n_taps):
        pool_brow += Wbd[t].sum(axis=1, keepdims=True) * brow_list[t][None, :]

    # --- fc_down weights hstacked; all biases folded; per-row LN params; branch mask ---
    Wd_wide = np.concatenate(
        [np.asarray(params["down"][bi]["w"], np.float32) for bi in range(3)], axis=1)  # [S, 3*IC]
    bias2 = np.zeros((rp, IC), np.float32)
    mask = np.zeros((rp, 3 * IC), np.float32)
    gamma = np.zeros((rp, IC), np.float32)
    beta = np.zeros((rp, IC), np.float32)
    for bi in range(3):
        r0, C = int(row_off[bi]), n_shots[bi]
        Wd = np.asarray(params["down"][bi]["w"], np.float32)
        bd = np.asarray(params["down"][bi]["b"], np.float32)
        bias_pool = np.zeros((C, S), np.float32)
        for ci in range(len(CONV_DEFS)):
            bconv = np.asarray(params["convs"][bi][ci][3], np.float32)    # [C]
            bias_pool += np.outer(bconv, q_list[ci])
        bias2[r0:r0 + C] = (bias_pool + pool_brow[r0:r0 + C]) @ Wd + bd[None, :]
        mask[r0:r0 + C, bi * IC:(bi + 1) * IC] = 1.0
        gamma[r0:r0 + C] = np.asarray(params["down"][bi]["gamma"], np.float32)
        beta[r0:r0 + C] = np.asarray(params["down"][bi]["beta"], np.float32)
    # padded rows (rows..rp) keep bias2 = gamma = beta = 0 -> their LN output is exactly 0.

    # --- mergePooling row replication as a 0/1 matrix (padded columns stay 0) ---
    split = seq_len // rows
    Mrep = np.zeros((seq_len, rp), np.float32)
    Mrep[np.arange(seq_len), np.minimum(np.arange(seq_len) // split, rows - 1)] = 1.0

    return dict(
        WbdP=jnp.asarray(WbdP, jnp.float32),          # small; keep f32
        WR_v=jnp.asarray(WR_v, jnp.bfloat16),         # dominant byte stream -> bf16 in HBM
        Wd_wide=jnp.asarray(Wd_wide, jnp.bfloat16),   # second biggest stream -> bf16 in HBM
        bias2=jnp.asarray(bias2, jnp.float32),
        mask=jnp.asarray(mask, jnp.float32),
        gamma=jnp.asarray(gamma, jnp.float32),
        beta=jnp.asarray(beta, jnp.float32),
        Mrep=jnp.asarray(Mrep, jnp.float32),
    )


# ---------------------------------------------------------------------------
# Fused Pallas kernel (batched grid; constants resident; everything in VMEM)
# ---------------------------------------------------------------------------

def fused_shot_kernel(seq_ref, wbdp_ref, wrv_ref, wdw_ref, bias2_ref, mask_ref,
                      gamma_ref, beta_ref, mrep_ref, o_ref):
    f32 = jnp.float32
    seq0 = seq_ref[0]                                             # [seq_len, IC], f32
    rp = bias2_ref.shape[0]
    IC = bias2_ref.shape[1]
    n_taps = wbdp_ref.shape[0] // rp

    # (1) overlapSeqGenerate + fc_up pooling + per-tap channel mix (left factor), all folded
    #     host-side:  X = [Wbd_t @ P_ov]_t  @ seq0                 -> [T*rp, IC]
    x = jnp.dot(wbdp_ref[...], seq0, preferred_element_type=f32)

    # (2) lay the T row-blocks side by side (sublane-aligned static slices, ~2 vregs each)
    xr = jnp.concatenate([x[t * rp:(t + 1) * rp, :] for t in range(n_taps)], axis=1)  # [rp, T*IC]

    # (3) conv taps + concat + AdaptiveAvgPool1d(S) (pre-multiplied by fc_up weight) in ONE dot.
    #     Weights streamed from HBM as bf16 (halves the dominant bytes); math stays f32.
    pooled = jnp.dot(xr, wrv_ref[...].astype(f32), preferred_element_type=f32)        # [rp, S]

    # (4) the 3 fc_down linears in one matmul + branch select + folded bias + ReLU
    zw = jnp.dot(pooled, wdw_ref[...].astype(f32), preferred_element_type=f32) * mask_ref[...]
    z = zw[:, 0:IC] + zw[:, IC:2 * IC] + zw[:, 2 * IC:3 * IC] + bias2_ref[...]
    z = jnp.maximum(z, 0.0)

    # (5) LayerNorm with per-row gamma/beta (f32 on VPU/EUP)
    mean = jnp.mean(z, axis=-1, keepdims=True)
    var = jnp.mean(jnp.square(z - mean), axis=-1, keepdims=True)
    zn = (z - mean) * jax.lax.rsqrt(var + 1e-5) * gamma_ref[...] + beta_ref[...]

    # (6) mergePooling (0/1 row-replication matmul) + residual add in f32
    o_ref[0] = seq0 + jnp.dot(mrep_ref[...], zn, preferred_element_type=f32)


def _const_spec(shape):
    nd = len(shape)
    return pl.BlockSpec(shape, lambda b, _nd=nd: (0,) * _nd)      # same block every grid step


def shot_level_forward(seq, consts):
    """seq: [B, seq_len, IC] -> [B, seq_len, IC]; each sample is an independent forward pass."""
    seq = seq.astype(jnp.float32)
    B, seq_len, IC = seq.shape

    const_args = (consts["WbdP"], consts["WR_v"], consts["Wd_wide"], consts["bias2"],
                  consts["mask"], consts["gamma"], consts["beta"], consts["Mrep"])

    rp = consts["bias2"].shape[0]
    TIC, S = consts["WR_v"].shape
    Trp = consts["WbdP"].shape[0]
    flops = 2 * B * (Trp * seq_len * IC + rp * TIC * S + rp * S * 3 * IC + seq_len * rp * IC)
    const_bytes = sum(int(np.prod(a.shape)) * a.dtype.itemsize for a in const_args)
    bytes_accessed = const_bytes + 2 * 4 * B * seq_len * IC

    in_specs = [pl.BlockSpec((1, seq_len, IC), lambda b: (b, 0, 0))]
    in_specs += [_const_spec(a.shape) for a in const_args]

    out = pl.pallas_call(
        fused_shot_kernel,
        out_shape=jax.ShapeDtypeStruct((B, seq_len, IC), jnp.float32),
        grid=(B,),
        in_specs=in_specs,
        out_specs=pl.BlockSpec((1, seq_len, IC), lambda b: (b, 0, 0)),
        compiler_params=pltpu.CompilerParams(dimension_semantics=("parallel",)),
        cost_estimate=pl.CostEstimate(flops=int(flops), transcendentals=int(B * rp),
                                      bytes_accessed=int(bytes_accessed)),
    )(seq, *const_args)
    return out


# ---------------------------------------------------------------------------
# Parameters (deterministic, synthetic) — same structure as the PyTorch module
# ---------------------------------------------------------------------------

def init_params(shot_num, shot_channel, input_channel, seed=1234):
    S, IC = shot_channel, input_channel
    keys = list(jax.random.split(jax.random.PRNGKey(seed), 64))
    it = iter(keys)

    def nrm(shape, scale=0.02):
        return scale * jax.random.normal(next(it), shape, dtype=jnp.float32)

    p = {}
    p["w_up"] = nrm((IC, S))              # fc_up weight, stored transposed (x @ w_up)
    p["b_up"] = nrm((S,), 0.01)

    p["convs"] = []
    for C in (shot_num, int(shot_num * 1.5), int(shot_num * 0.5)):
        branch = []
        for (k, d) in CONV_DEFS:
            branch.append((k, d, nrm((C, C, k), 0.1), nrm((C,), 0.05)))
        p["convs"].append(branch)

    p["down"] = []
    for _ in range(3):
        p["down"].append(dict(
            w=nrm((S, IC)),               # fc_down weight, stored transposed (x @ w)
            b=nrm((IC,), 0.01),
            gamma=jnp.ones((IC,), jnp.float32),
            beta=jnp.zeros((IC,), jnp.float32),
        ))
    return p


# ---------------------------------------------------------------------------
# Pure-JAX reference (mirrors the PyTorch forward exactly) for a sanity check
# ---------------------------------------------------------------------------

def overlap_seq_generate(seq, overlap_ratio, shot_num):
    seq_len = seq.shape[1]
    sc = seq_len // shot_num
    of = max(int(overlap_ratio * sc), 1)
    parts = []
    for i in range(shot_num):
        if i == 0:
            parts.append(seq[:, -of:, :])
        else:
            parts.append(seq[:, i * sc - of:i * sc, :])
        parts.append(seq[:, i * sc:(i + 1) * sc, :])
    parts.append(seq[:, sc * shot_num:, :])
    return jnp.concatenate(parts, axis=1)


def reference_forward(seq, params, shot_num, shot_channel, input_channel, overlap_ratio):
    S, IC = shot_channel, input_channel
    seq_len = seq.shape[1]
    x_ov = overlap_seq_generate(seq, overlap_ratio, shot_num)[0]
    y = x_ov @ params["w_up"] + params["b_up"]                             # [L_ov, S]
    n_shots = [shot_num, int(shot_num * 1.5), int(shot_num * 0.5)]
    outs = []
    for bi, n in enumerate(n_shots):
        P1 = jnp.asarray(adaptive_pool_matrix(y.shape[0], n))
        x = P1 @ y                                                         # [C, S]
        conv_outs = []
        for (k, d, W, b) in params["convs"][bi]:
            L = conv_out_len(S, k, d)
            o = jnp.zeros((n, L), jnp.float32)
            for t in range(k):
                xs = x[:, t * d:t * d + 4 * L:4]                           # stride-4 conv taps
                o = o + W[:, :, t] @ xs
            conv_outs.append(o + b[:, None])
        cc = jnp.concatenate(conv_outs, axis=1)
        P2 = jnp.asarray(adaptive_pool_matrix(cc.shape[1], S))
        pooled = cc @ P2.T
        dn = params["down"][bi]
        z = jnp.maximum(pooled @ dn["w"] + dn["b"], 0.0)
        mean = z.mean(-1, keepdims=True)
        var = ((z - mean) ** 2).mean(-1, keepdims=True)
        outs.append((z - mean) / jnp.sqrt(var + 1e-5) * dn["gamma"] + dn["beta"])
    shot_sum = jnp.concatenate(outs, axis=0)
    rows = shot_sum.shape[0]
    sc = seq_len // rows
    row_idx = np.minimum(np.arange(seq_len) // sc, rows - 1)
    merged = shot_sum[jnp.asarray(row_idx)]
    return (seq[0] + merged)[None]


# ---------------------------------------------------------------------------

if __name__ == "__main__":
    # Small, consistent shapes: seq [batch=2, seq_len=64, emb=input_channel=128]
    shot_num = 4
    shot_channel = 256
    input_channel = 128
    overlap_ratio = 0.25
    seq_len = 64
    batch = 2

    params = init_params(shot_num, shot_channel, input_channel, seed=1234)
    seq = jax.random.normal(jax.random.PRNGKey(0), (batch, seq_len, input_channel),
                            dtype=jnp.float32)

    consts = build_constants(params, shot_num, shot_channel, input_channel,
                             overlap_ratio, seq_len)

    out = jax.block_until_ready(shot_level_forward(seq, consts))
    assert out.shape == (batch, seq_len, input_channel)

    for b in range(batch):
        ref_b = jax.block_until_ready(
            reference_forward(seq[b:b + 1], params, shot_num, shot_channel,
                              input_channel, overlap_ratio))
        np.testing.assert_allclose(np.asarray(out[b:b + 1]), np.asarray(ref_b),
                                   rtol=1e-2, atol=1e-2)

    print("KERNEL_OK")
</pallas_src>

<mosaic_0001>
module attributes {stable_mosaic.version = 11 : i64} {
  func.func @fused_shot_kernel(%arg0: i32, %arg1: memref<1x64x128xf32, #tpu.memory_space<vmem>>, %arg2: memref<160x64xf32, #tpu.memory_space<vmem>>, %arg3: memref<1280x256xbf16, #tpu.memory_space<vmem>>, %arg4: memref<256x384xbf16, #tpu.memory_space<vmem>>, %arg5: memref<16x128xf32, #tpu.memory_space<vmem>>, %arg6: memref<16x384xf32, #tpu.memory_space<vmem>>, %arg7: memref<16x128xf32, #tpu.memory_space<vmem>>, %arg8: memref<16x128xf32, #tpu.memory_space<vmem>>, %arg9: memref<64x16xf32, #tpu.memory_space<vmem>>, %arg10: memref<1x64x128xf32, #tpu.memory_space<vmem>>) attributes {dimension_semantics = [#tpu.dimension_semantics<parallel>], iteration_bounds = array<i64: 2>, scalar_prefetch = 0 : i64, scratch_operands = 0 : i64, tpu.core_type = #tpu.core_type<tc>, window_params = [{transform_indices = @transform_0, window_bounds = array<i64: 1, 64, 128>}, {pipeline_mode = #tpu.pipeline_mode<synchronous>, transform_indices = @transform_1, window_bounds = array<i64: 160, 64>}, {pipeline_mode = #tpu.pipeline_mode<synchronous>, transform_indices = @transform_2, window_bounds = array<i64: 1280, 256>}, {pipeline_mode = #tpu.pipeline_mode<synchronous>, transform_indices = @transform_3, window_bounds = array<i64: 256, 384>}, {pipeline_mode = #tpu.pipeline_mode<synchronous>, transform_indices = @transform_4, window_bounds = array<i64: 16, 128>}, {pipeline_mode = #tpu.pipeline_mode<synchronous>, transform_indices = @transform_5, window_bounds = array<i64: 16, 384>}, {pipeline_mode = #tpu.pipeline_mode<synchronous>, transform_indices = @transform_6, window_bounds = array<i64: 16, 128>}, {pipeline_mode = #tpu.pipeline_mode<synchronous>, transform_indices = @transform_7, window_bounds = array<i64: 16, 128>}, {pipeline_mode = #tpu.pipeline_mode<synchronous>, transform_indices = @transform_8, window_bounds = array<i64: 64, 16>}, {transform_indices = @transform_9, window_bounds = array<i64: 1, 64, 128>}]} {
    %c0 = arith.constant 0 : index
    %c0_0 = arith.constant 0 : index
    %c0_1 = arith.constant 0 : index
    %0 = vector.load %arg1[%c0, %c0_0, %c0_1] : memref<1x64x128xf32, #tpu.memory_space<vmem>>, vector<1x64x128xf32>
    %1 = vector.shape_cast %0 : vector<1x64x128xf32> to vector<64x128xf32>
    %c0_2 = arith.constant 0 : index
    %c0_3 = arith.constant 0 : index
    %2 = vector.load %arg2[%c0_2, %c0_3] : memref<160x64xf32, #tpu.memory_space<vmem>>, vector<160x64xf32>
    %cst = arith.constant dense<0.000000e+00> : vector<160x128xf32>
    %3 = tpu.matmul %2, %1, %cst {dimension_numbers = #tpu.dot_dimension_numbers<[1], [0], [0], [1], [0, 0, 1, 1], [], []>} : vector<160x64xf32>, vector<64x128xf32>, vector<160x128xf32> -> vector<160x128xf32>
    %4 = vector.extract_strided_slice %3 {offsets = [0, 0], sizes = [16, 128], strides = [1, 1]} : vector<160x128xf32> to vector<16x128xf32>
    %5 = vector.extract_strided_slice %3 {offsets = [16, 0], sizes = [16, 128], strides = [1, 1]} : vector<160x128xf32> to vector<16x128xf32>
    %6 = vector.extract_strided_slice %3 {offsets = [32, 0], sizes = [16, 128], strides = [1, 1]} : vector<160x128xf32> to vector<16x128xf32>
    %7 = vector.extract_strided_slice %3 {offsets = [48, 0], sizes = [16, 128], strides = [1, 1]} : vector<160x128xf32> to vector<16x128xf32>
    %8 = vector.extract_strided_slice %3 {offsets = [64, 0], sizes = [16, 128], strides = [1, 1]} : vector<160x128xf32> to vector<16x128xf32>
    %9 = vector.extract_strided_slice %3 {offsets = [80, 0], sizes = [16, 128], strides = [1, 1]} : vector<160x128xf32> to vector<16x128xf32>
    %10 = vector.extract_strided_slice %3 {offsets = [96, 0], sizes = [16, 128], strides = [1, 1]} : vector<160x128xf32> to vector<16x128xf32>
    %11 = vector.extract_strided_slice %3 {offsets = [112, 0], sizes = [16, 128], strides = [1, 1]} : vector<160x128xf32> to vector<16x128xf32>
    %12 = vector.extract_strided_slice %3 {offsets = [128, 0], sizes = [16, 128], strides = [1, 1]} : vector<160x128xf32> to vector<16x128xf32>
    %13 = vector.extract_strided_slice %3 {offsets = [144, 0], sizes = [16, 128], strides = [1, 1]} : vector<160x128xf32> to vector<16x128xf32>
    %14 = tpu.concatenate %4, %5, %6, %7, %8, %9, %10, %11, %12, %13 in 1 : vector<16x128xf32>, vector<16x128xf32>, vector<16x128xf32>, vector<16x128xf32>, vector<16x128xf32>, vector<16x128xf32>, vector<16x128xf32>, vector<16x128xf32>, vector<16x128xf32>, vector<16x128xf32> -> vector<16x1280xf32>
    %c0_4 = arith.constant 0 : index
    %c0_5 = arith.constant 0 : index
    %15 = vector.load %arg3[%c0_4, %c0_5] : memref<1280x256xbf16, #tpu.memory_space<vmem>>, vector<1280x256xbf16>
    %16 = arith.extf %15 : vector<1280x256xbf16> to vector<1280x256xf32>
    %cst_6 = arith.constant dense<0.000000e+00> : vector<16x256xf32>
    %17 = tpu.matmul %14, %16, %cst_6 {dimension_numbers = #tpu.dot_dimension_numbers<[1], [0], [0], [1], [0, 0, 1, 1], [], []>} : vector<16x1280xf32>, vector<1280x256xf32>, vector<16x256xf32> -> vector<16x256xf32>
    %c0_7 = arith.constant 0 : index
    %c0_8 = arith.constant 0 : index
    %18 = vector.load %arg4[%c0_7, %c0_8] : memref<256x384xbf16, #tpu.memory_space<vmem>>, vector<256x384xbf16>
    %19 = arith.extf %18 : vector<256x384xbf16> to vector<256x384xf32>
    %cst_9 = arith.constant dense<0.000000e+00> : vector<16x384xf32>
    %20 = tpu.matmul %17, %19, %cst_9 {dimension_numbers = #tpu.dot_dimension_numbers<[1], [0], [0], [1], [0, 0, 1, 1], [], []>} : vector<16x256xf32>, vector<256x384xf32>, vector<16x384xf32> -> vector<16x384xf32>
    %c0_10 = arith.constant 0 : index
    %c0_11 = arith.constant 0 : index
    %21 = vector.load %arg6[%c0_10, %c0_11] : memref<16x384xf32, #tpu.memory_space<vmem>>, vector<16x384xf32>
    %22 = arith.mulf %20, %21 : vector<16x384xf32>
    %23 = vector.extract_strided_slice %22 {offsets = [0, 0], sizes = [16, 128], strides = [1, 1]} : vector<16x384xf32> to vector<16x128xf32>
    %24 = vector.extract_strided_slice %22 {offsets = [0, 128], sizes = [16, 128], strides = [1, 1]} : vector<16x384xf32> to vector<16x128xf32>
    %25 = arith.addf %23, %24 : vector<16x128xf32>
    %26 = vector.extract_strided_slice %22 {offsets = [0, 256], sizes = [16, 128], strides = [1, 1]} : vector<16x384xf32> to vector<16x128xf32>
    %27 = arith.addf %25, %26 : vector<16x128xf32>
    %c0_12 = arith.constant 0 : index
    %c0_13 = arith.constant 0 : index
    %28 = vector.load %arg5[%c0_12, %c0_13] : memref<16x128xf32, #tpu.memory_space<vmem>>, vector<16x128xf32>
    %29 = arith.addf %27, %28 : vector<16x128xf32>
    %cst_14 = arith.constant 0.000000e+00 : f32
    %30 = vector.broadcast %cst_14 : f32 to vector<16x128xf32>
    %31 = arith.maximumf %29, %30 : vector<16x128xf32>
    %cst_15 = arith.constant dense<0.000000e+00> : vector<16xf32>
    %32 = vector.multi_reduction <add>, %31, %cst_15 [1] : vector<16x128xf32> to vector<16xf32>
    %33 = vector.shape_cast %32 : vector<16xf32> to vector<16x1xf32>
    %cst_16 = arith.constant 1.280000e+02 : f32
    %34 = vector.broadcast %cst_16 : f32 to vector<16x1xf32>
    %35 = arith.divf %33, %34 : vector<16x1xf32>
    %36 = vector.broadcast %35 : vector<16x1xf32> to vector<16x128xf32>
    %37 = arith.subf %31, %36 : vector<16x128xf32>
    %38 = arith.mulf %37, %37 : vector<16x128xf32>
    %cst_17 = arith.constant dense<0.000000e+00> : vector<16xf32>
    %39 = vector.multi_reduction <add>, %38, %cst_17 [1] : vector<16x128xf32> to vector<16xf32>
    %40 = vector.shape_cast %39 : vector<16xf32> to vector<16x1xf32>
    %cst_18 = arith.constant 1.280000e+02 : f32
    %41 = vector.broadcast %cst_18 : f32 to vector<16x1xf32>
    %42 = arith.divf %40, %41 : vector<16x1xf32>
    %43 = vector.broadcast %35 : vector<16x1xf32> to vector<16x128xf32>
    %44 = arith.subf %31, %43 : vector<16x128xf32>
    %cst_19 = arith.constant 9.99999974E-6 : f32
    %45 = vector.broadcast %cst_19 : f32 to vector<16x1xf32>
    %46 = arith.addf %42, %45 : vector<16x1xf32>
    %47 = math.rsqrt %46 : vector<16x1xf32>
    %48 = vector.broadcast %47 : vector<16x1xf32> to vector<16x128xf32>
    %49 = arith.mulf %44, %48 : vector<16x128xf32>
    %c0_20 = arith.constant 0 : index
    %c0_21 = arith.constant 0 : index
    %50 = vector.load %arg7[%c0_20, %c0_21] : memref<16x128xf32, #tpu.memory_space<vmem>>, vector<16x128xf32>
    %51 = arith.mulf %49, %50 : vector<16x128xf32>
    %c0_22 = arith.constant 0 : index
    %c0_23 = arith.constant 0 : index
    %52 = vector.load %arg8[%c0_22, %c0_23] : memref<16x128xf32, #tpu.memory_space<vmem>>, vector<16x128xf32>
    %53 = arith.addf %51, %52 : vector<16x128xf32>
    %c0_24 = arith.constant 0 : index
    %c0_25 = arith.constant 0 : index
    %54 = vector.load %arg9[%c0_24, %c0_25] : memref<64x16xf32, #tpu.memory_space<vmem>>, vector<64x16xf32>
    %cst_26 = arith.constant dense<0.000000e+00> : vector<64x128xf32>
    %55 = tpu.matmul %54, %53, %cst_26 {dimension_numbers = #tpu.dot_dimension_numbers<[1], [0], [0], [1], [0, 0, 1, 1], [], []>} : vector<64x16xf32>, vector<16x128xf32>, vector<64x128xf32> -> vector<64x128xf32>
    %56 = arith.addf %1, %55 : vector<64x128xf32>
    %c0_27 = arith.constant 0 : index
    %c0_28 = arith.constant 0 : index
    %c0_29 = arith.constant 0 : index
    %57 = vector.load %arg10[%c0_27, %c0_28, %c0_29] : memref<1x64x128xf32, #tpu.memory_space<vmem>>, vector<1x64x128xf32>
    %58 = vector.shape_cast %57 : vector<1x64x128xf32> to vector<64x128xf32>
    %59 = vector.shape_cast %56 : vector<64x128xf32> to vector<1x64x128xf32>
    tpu.vector_store %arg10[%c0_27, %c0_28, %c0_29], %59 {strides = array<i32>} : memref<1x64x128xf32, #tpu.memory_space<vmem>>, vector<1x64x128xf32>,
    return
  }
  func.func @transform_0(%arg0: i32) -> (i32, i32, i32) {
    %c0_i32 = arith.constant 0 : i32
    %c0_i32_0 = arith.constant 0 : i32
    %c0_i32_1 = arith.constant 0 : i32
    return %arg0, %c0_i32, %c0_i32_0 : i32, i32, i32
  }
  func.func @transform_1(%arg0: i32) -> (i32, i32) {
    %c0_i32 = arith.constant 0 : i32
    %c0_i32_0 = arith.constant 0 : i32
    %c0_i32_1 = arith.constant 0 : i32
    return %c0_i32, %c0_i32_0 : i32, i32
  }
  func.func @transform_2(%arg0: i32) -> (i32, i32) {
    %c0_i32 = arith.constant 0 : i32
    %c0_i32_0 = arith.constant 0 : i32
    %c0_i32_1 = arith.constant 0 : i32
    return %c0_i32, %c0_i32_0 : i32, i32
  }
  func.func @transform_3(%arg0: i32) -> (i32, i32) {
    %c0_i32 = arith.constant 0 : i32
    %c0_i32_0 = arith.constant 0 : i32
    %c0_i32_1 = arith.constant 0 : i32
    return %c0_i32, %c0_i32_0 : i32, i32
  }
  func.func @transform_4(%arg0: i32) -> (i32, i32) {
    %c0_i32 = arith.constant 0 : i32
    %c0_i32_0 = arith.constant 0 : i32
    %c0_i32_1 = arith.constant 0 : i32
    return %c0_i32, %c0_i32_0 : i32, i32
  }
  func.func @transform_5(%arg0: i32) -> (i32, i32) {
    %c0_i32 = arith.constant 0 : i32
    %c0_i32_0 = arith.constant 0 : i32
    %c0_i32_1 = arith.constant 0 : i32
    return %c0_i32, %c0_i32_0 : i32, i32
  }
  func.func @transform_6(%arg0: i32) -> (i32, i32) {
    %c0_i32 = arith.constant 0 : i32
    %c0_i32_0 = arith.constant 0 : i32
    %c0_i32_1 = arith.constant 0 : i32
    return %c0_i32, %c0_i32_0 : i32, i32
  }
  func.func @transform_7(%arg0: i32) -> (i32, i32) {
    %c0_i32 = arith.constant 0 : i32
    %c0_i32_0 = arith.constant 0 : i32
    %c0_i32_1 = arith.constant 0 : i32
    return %c0_i32, %c0_i32_0 : i32, i32
  }
  func.func @transform_8(%arg0: i32) -> (i32, i32) {
    %c0_i32 = arith.constant 0 : i32
    %c0_i32_0 = arith.constant 0 : i32
    %c0_i32_1 = arith.constant 0 : i32
    return %c0_i32, %c0_i32_0 : i32, i32
  }
  func.func @transform_9(%arg0: i32) -> (i32, i32, i32) {
    %c0_i32 = arith.constant 0 : i32
    %c0_i32_0 = arith.constant 0 : i32
    %c0_i32_1 = arith.constant 0 : i32
    return %arg0, %c0_i32, %c0_i32_0 : i32, i32, i32
  }
}

</mosaic_0001>

<bundles_post_ra>
// kernel: tpu_custom_call.1
= control target key start
LH: loop header
LB: loop body
LE: loop exit
PB: predicated region body
PF: predicated region fallthrough
CT: control target
= control target key end

     0   :  { %14 = vsyncpa [#allocation3], 0  ;;  %s3885_s0 = inlined_call_operand.vmem [shape: f32[2,64,128], index: 0, kind: input, shape index: {}]   ;;  %s3886_s1 = inlined_call_operand.vmem [shape: f32[160,64], index: 1, kind: input, shape index: {}]   ;;  %s3887_s2 = inlined_call_operand.hbm [shape: bf16[1280,256], index: 2, kind: input, shape index: {}]   ;;  %s3888_s3 = inlined_call_operand.hbm [shape: bf16[256,384], index: 3, kind: input, shape index: {}]   ;;  %s3889_s4 = inlined_call_operand.vmem [shape: f32[16,128], index: 4, kind: input, shape index: {}]   ;;  %s3890_s5 = inlined_call_operand.vmem [shape: f32[16,384], index: 5, kind: input, shape index: {}]   ;;  %s3891_s6 = inlined_call_operand.vmem [shape: f32[16,128], index: 6, kind: input, shape index: {}]   ;;  %s3892_s7 = inlined_call_operand.vmem [shape: f32[16,128], index: 7, kind: input, shape index: {}]   ;;  %s3893_s8 = inlined_call_operand.vmem [shape: f32[64,16], index: 8, kind: input, shape index: {}]   ;;  %s3894_s9 = inlined_call_operand.hbm [shape: f32[2,64,128], index: 9, kind: output, shape index: {}]  }
   0x1   :  { %15 = vsyncpa [#allocation6], 0 }
   0x2   :  { %16 = vsyncpa [#allocation4], 0 }
   0x3   :  { %18 = vsyncpa [#allocation4 + $0x1], 0  ;;  %s3510_s30 = smov 0   ;;  %s3512_s10 = smov 0  }
   0x4   :  { %s3514_s11 = smov 0   ;;  %s3516_s12 = smov 0  }
   0x5 LB: > { %3901 = sst [smem:[#allocation11_spill]] %s3445_s11  ;;  %s3531_s13 = sadd.s32 4294967295, %s3449_s12   ;;  %s3449_s12 = sphi %s3516_s12, %s3915_s12   ;;  %s3445_s11 = sphi %s3514_s11, %s3917_s11   ;;  %s3441_s10 = sphi %s3512_s10, %s3919_s10   ;;  %s3437_s30 = sphi %s3510_s30, %s3918_s30  }
   0x6   : > { %s2097_s14 = sadd.s32 4294967294, %s3449_s12   ;;  %s3535_s15 = sadd.s32 1, %s3449_s12  }
   0x7   : > { %3902 = sst [smem:[#allocation12_spill]] %s3535_s15  ;;  %s225_s16 = sadd.s32 1, %s3445_s11 }
   0x8   : > { %s222_s17 = ssub.s32 %s3449_s12, %s3535_s15  ;;  %p235_p0 = scmp.ne.s32.totalorder %s3445_s11, %s3441_s10 }
   0x9   : > { %p223_p1 = scmp.eq.s32.totalorder %s222_s17, 0  ;;  %p236_p2 = scmp.eq.s32.totalorder %s3531_s13, 1 }
   0xa   : > { %p241_p3 = scmp.ne.s32.totalorder %s3441_s10, %s3437_s30  ;;  %p242_p4 = scmp.eq.s32.totalorder %s2097_s14, 1 }
   0xb   : > { %s3546_s18 = scalar_select %p223_p1, %s3445_s11, %s225_s16  }
   0xc   : > { %p3548_p5 = por %p236_p2, %p235_p0  ;;  %p3552_p6 = por %p242_p4, %p241_p3 }
   0xd   : > { %3903 = sst [smem:[#allocation13_spill]] %s3546_s18  ;;  %p2098_p7 = scmp.ge.s32.totalorder %s3449_s12, 1 }
   0xe   : > { %s3904_s19 = scalar_select %p3548_p5, 1, 0 }
   0xf   : > { %s3905_s20 = scalar_select %p3552_p6, 1, 0 }
  0x10   : > { %p249_p8 = scmp.lt.s32.totalorder %s3449_s12, 3  ;;  %p3895_p9 = scmp.eq.s32.totalorder %s3531_s13, 0 }
  0x11   : > { %s3451_s22 = smov [#allocation2]   ;;  %s3452_s25 = smov [#allocation5]  }
  0x12   : > { %p3559_p10 = pnand %p2098_p7, %p249_p8  ;;  %s264_s23 = sshll.u32 %s3451_s22, 4  ;;  %s265_s23 = int_to_ptr.vmem [resolvable:$true] %s264_s23 }
  0x13   : > { %s277_s26 = sshll.u32 %s3452_s25, 4  ;;  %s3323_s29 = scalar_lea.hbm %s3887_s2, 20480  ;;  %s3571_s26 = int_to_ptr.vmem [resolvable:$true] %s277_s26 }
  0x14   : > { %s3906_s21 = scalar_select %p3559_p10, 1, 0 }
  0x15   : > { %p2951_p11 = pneg %p3559_p10  ;;  %p3324_p13 = scmp.ne.s32.totalorder %s3887_s2, %s3323_s29 }
  0x16   : > { %p3330_p3 = scmp.lt.u32.totalorder %s3323_s29, %s3887_s2 }
  0x17   : > { %p3567_p12 = pnand %p3895_p9, %p2951_p11 }
  0x19   : > { %p3325_p0 = pneg %p3567_p12 }
  0x1b   : > { %p3326_p1 = pnand %p3325_p0, %p3324_p13 }
  0x1d   : > { %p3327_p2 = pneg %p3326_p1 }
  0x1f   : > { %p3332_p4 = pnand %p3330_p3, %p3327_p2 }
  0x21   : > { %3335 = shalt.err (!%p3332_p4)
}
  0x22   : > { %s3336_s25 = scalar_lea.vmem %s265_s23, 20480  ;;  %p3344_p9 = scmp.lt.s32.totalorder %s265_s23, %s265_s23 }
  0x23   : > { %p3337_p7 = scmp.ne.s32.totalorder %s265_s23, %s3336_s25  ;;  %p3345_p6 = scmp.lt.s32.totalorder %s3336_s25, %s3336_s25 }
  0x25   : > { %p3339_p8 = pnand %p3337_p7, %p3325_p0  ;;  %p3346_p5 = por %p3345_p6, %p3344_p9 }
  0x27   : > { %p3340_p11 = pneg %p3339_p8 }
  0x29   : > { %p3347_p10 = pnand %p3346_p5, %p3340_p11 }
  0x2b   : > { %3350 = shalt.err (!%p3347_p10)
}
  0x2c   : > { %s3453_s27 = smov 128   ;;  %s3454_s28 = smov 8  }
  0x2d   : > { %2954 = dma.hbm_to_vmem [thread:$0]  (!%p3567_p12), %s3887_s2, 20480, %s265_s23, [#allocation3], %s3453_s27, %s3453_s27, %s3454_s28  }
  0x2e   : > { %s3351_s22 = scalar_lea.hbm %s3888_s3, 6144 }
  0x2f   : > { %p3352_p13 = scmp.ne.s32.totalorder %s3888_s3, %s3351_s22  ;;  %p3358_p9 = scmp.lt.u32.totalorder %s3351_s22, %s3888_s3 }
  0x31   : > { %p3354_p5 = pnand %p3352_p13, %p3325_p0 }
  0x33   : > { %p3355_p6 = pneg %p3354_p5 }
  0x35   : > { %p3360_p10 = pnand %p3358_p9, %p3355_p6 }
  0x37   : > { %3363 = shalt.err (!%p3360_p10)
}
  0x38   : > { %s3364_s23 = scalar_lea.vmem %s3571_s26, 6144  ;;  %p3372_p4 = scmp.lt.s32.totalorder %s3571_s26, %s3571_s26 }
  0x39   : > { %p3365_p1 = scmp.ne.s32.totalorder %s3571_s26, %s3364_s23  ;;  %p3373_p7 = scmp.lt.s32.totalorder %s3364_s23, %s3364_s23 }
  0x3b   : > { %p3367_p2 = pnand %p3365_p1, %p3325_p0  ;;  %p3374_p8 = por %p3373_p7, %p3372_p4 }
  0x3d   : > { %p3368_p3 = pneg %p3367_p2 }
  0x3f   : > { %p3375_p11 = pnand %p3374_p8, %p3368_p3 }
  0x41   : > { %3378 = shalt.err (!%p3375_p11)
}
  0x42   : > { %s3455_s11 = smov 192   ;;  %s3456_s15 = smov 12  }
  0x43   : > { %2957 = dma.hbm_to_vmem [thread:$0]  (!%p3567_p12), %s3888_s3, 6144, %s3571_s26, [#allocation6], %s3455_s11, %s3455_s11, %s3456_s15  }
  0x44   : > { %p3908_p13 = scmp.ne.s32.totalorder %s3906_s21, 0 }
  0x45   : > { %p3909_p0 = scmp.eq.s32.totalorder (!%p3908_p13), %s3531_s13, 0 }
  0x46   : > { %316 = sbr.rel (%p3908_p13) target bundleno = 1558 (0x616), region = 56 }
  0x4d   : > { %3424 = dma.done.wait (%p3909_p0), [#allocation3], 20480   ;;  %p3910_p5 = pmov %p3909_p0 }
  0x4e   : > { %p3911_p6 = pmov %p3909_p0 }
  0x4f   : > { %3426 = vsyncadd (%p3910_p5), [#allocation3], 4294946816 }
  0x50   : > { %3428 = dma.done.wait (%p3911_p6), [#allocation6], 6144   ;;  %p3912_p9 = pmov %p3909_p0 }
  0x51   : > { %p356_p10 = scmp.lt.s32.totalorder %s3531_s13, 1  ;;  %vm389_vm0 = vcmask 523264   ;;  %v369_v8 = vld [vmem:[%s3886_s1] sm:$0xff]  ;;  %v370_v16 = vld [vmem:[%s3886_s1 + $0x8] sm:$0xff]  ;;  %v3019_v17 = vld [vmem:[#allocation2 + $0x114] ss:$8 sps:$4 sm:$0xff]  }
  0x52   : > { %3430 = vsyncadd (%p3912_p9), [#allocation6], 4294961152  ;;  %2235 = vmatprep.mubr.msk.f32.mxu0 %vm389_vm0, %v369_v8  ;;  %v3013_v13 = vld [vmem:[#allocation2 + $0x104] ss:$8 sps:$4 sm:$0xff]   ;;  %v3018_v15 = vld [vmem:[#allocation2 + $0x100] ss:$8 sps:$4 sm:$0xff]  }
  0x53   : > { %s357_s24 = scalar_select %p356_p10, %s3531_s13, 1  ;;  %v3007_v14 = vld [vmem:[#allocation2 + $0x4] ss:$8 sps:$4 sm:$0xff]   ;;  %2362 = vmatprep.subr.bf16.mxu1 %v3013_v13  ;;  %v371_v18 = vld [vmem:[%s3886_s1 + $0x10] sm:$0xff]  ;;  %v3009_v19 = vld [vmem:[#allocation2] ss:$8 sps:$4 sm:$0xff]  }
  0x54   : > { %2364 = vmatpush1.bf16.msra.mxu1 %v3018_v15  ;;  %v3024_v20 = vld [vmem:[#allocation2 + $0x110] ss:$8 sps:$4 sm:$0xff]   ;;  %v3010_v21 = vld [vmem:[#allocation2 + $0x14] ss:$8 sps:$4 sm:$0xff]   ;;  %v3025_v22 = vld [vmem:[#allocation2 + $0x124] ss:$8 sps:$4 sm:$0xff]  }
  0x55   : > { %s2141_s26 = sshll.u32 %s357_s24, 6  ;;  %2366 = vmatprep.subr.bf16.mxu1 %v3019_v17  ;;  %v372_v23 = vld [vmem:[%s3886_s1 + $0x18] sm:$0xff]  ;;  %v373_v24 = vld [vmem:[%s3886_s1 + $0x20] sm:$0xff]  ;;  %v374_v29 = vld [vmem:[%s3886_s1 + $0x28] sm:$0xff]  ;;  %vm1853_vm1 = vcmask 130048   ;;  %s353_s24 = sand.u32 1, %s3441_s10  }
  0x56   : > { %s3635_s29 = scalar_lea.vmem %s3885_s0, %s2141_s26  ;;  %v3030_v25 = vld [vmem:[#allocation2 + $0x120] ss:$8 sps:$4 sm:$0xff]   ;;  %v3012_v26 = vld [vmem:[#allocation2 + $0x10] ss:$8 sps:$4 sm:$0xff]   ;;  %v3015_v27 = vld [vmem:[#allocation2 + $0x24] ss:$8 sps:$4 sm:$0xff]  }
  0x57   : > { %v361_v0 = vld [vmem:[%s3635_s29] sm:$0xff]  ;;  %v362_v1 = vld [vmem:[%s3635_s29 + $0x8] sm:$0xff]  ;;  %v363_v2 = vld [vmem:[%s3635_s29 + $0x10] sm:$0xff]  ;;  %s2105_s26 = sshll.u32 %s353_s24, 6  ;;  %s2142_s14 = sshll.u32 %s3531_s13, 10 }
  0x58   : > { %v2281_v3 = vpack.c.bf16 %v362_v1, %v361_v0  ;;  %v364_v4 = vld [vmem:[%s3635_s29 + $0x18] sm:$0xff]  ;;  %v365_v6 = vld [vmem:[%s3635_s29 + $0x20] sm:$0xff]  ;;  %v366_v7 = vld [vmem:[%s3635_s29 + $0x28] sm:$0xff]  ;;  %2368 = vmatpush1.bf16.msra.mxu1 %v3024_v20  ;;  %s355_s28 = scalar_lea.vmem [#allocation7], %s2105_s26  ;;  %s3839_s22 = scalar_lea.hbm %s3894_s9, %s2142_s14 }
  0x59   : > { %v2285_v5 = vpack.c.bf16 %v364_v4, %v363_v2  ;;  %v2289_v9 = vpack.c.bf16 %v366_v7, %v365_v6  ;;  %v367_v10 = vld [vmem:[%s3635_s29 + $0x30] sm:$0xff]  ;;  %v368_v11 = vld [vmem:[%s3635_s29 + $0x38] sm:$0xff]  ;;  %2370 = vmatprep.subr.bf16.mxu1 %v3025_v22  ;;  %v3017_v31 = vld [vmem:[#allocation2 + $0x20] ss:$8 sps:$4 sm:$0xff]   ;;  %s2013_s21 = sshll.u32 %s355_s28, 4  ;;  %s3844_s13 = scalar_lea.sflag [#allocation4], %s353_s24  ;;  %s3833_s21 = int_to_ptr.vmem [resolvable:$true] %s2013_s21 }
  0x5a   : > { %2282 = vmatprep.subr.bf16.mxu0 %v2281_v3  ;;  %v2293_v12 = vpack.c.bf16 %v368_v11, %v367_v10  ;;  %v3031_v28 = vld [vmem:[#allocation2 + $0x134] ss:$8 sps:$4 sm:$0xff]   ;;  %v3036_v32 = vld [vmem:[#allocation2 + $0x130] ss:$8 sps:$4 sm:$0xff]   ;;  %v3037_v34 = vld [vmem:[#allocation2 + $0x144] ss:$8 sps:$4 sm:$0xff]  }
  0x5b   : > { %2284 = vmatpush3.bf16.msra.mxu0 %v2281_v3  ;;  %v375_v30 = vld [vmem:[%s3886_s1 + $0x30] sm:$0xff]  ;;  %v376_v35 = vld [vmem:[%s3886_s1 + $0x38] sm:$0xff]  ;;  %v377_v36 = vld [vmem:[%s3886_s1 + $0x40] sm:$0xff]  ;;  %s3379_s25 = scalar_lea.vmem %s3833_s21, 1024  ;;  %p3913_p1 = scmp.ne.s32.totalorder %s3904_s19, 0 }
  0x5c   : > { %2286 = vmatprep.subr.bf16.mxu0 %v2285_v5  ;;  %2372 = vmatpush1.bf16.msra.mxu1 %v3030_v25  ;;  %v3021_v33 = vld [vmem:[#allocation2 + $0x34] ss:$8 sps:$4 sm:$0xff]   ;;  %v3042_v37 = vld [vmem:[#allocation2 + $0x140] ss:$8 sps:$4 sm:$0xff]   ;;  %v3023_v38 = vld [vmem:[#allocation2 + $0x30] ss:$8 sps:$4 sm:$0xff]   ;;  %p3380_p12 = scmp.ne.s32.totalorder %s3833_s21, %s3379_s25 }
  0x5d   : > { %2374 = vmatprep.subr.bf16.mxu1 %v3031_v28  ;;  %v3027_v39 = vld [vmem:[#allocation2 + $0x44] ss:$8 sps:$4 sm:$0xff]   ;;  %v3043_v40 = vld [vmem:[#allocation2 + $0x154] ss:$8 sps:$4 sm:$0xff]   ;;  %v3029_v43 = vld [vmem:[#allocation2 + $0x40] ss:$8 sps:$4 sm:$0xff]  }
  0x5e   : > { %v378_v41 = vld [vmem:[%s3886_s1 + $0x48] sm:$0xff]  ;;  %v379_v42 = vld [vmem:[%s3886_s1 + $0x50] sm:$0xff]  ;;  %v380_v47 = vld [vmem:[%s3886_s1 + $0x58] sm:$0xff]  ;;  %p3381_p2 = pnand %p3380_p12, %p3913_p1  ;;  %s3457_s23 = smov [#allocation7]  }
  0x5f   : > { %2288 = vmatpush3.bf16.msra.mxu0 %v2285_v5  ;;  %v3048_v44 = vld [vmem:[#allocation2 + $0x150] ss:$8 sps:$4 sm:$0xff]   ;;  %v3033_v45 = vld [vmem:[#allocation2 + $0x54] ss:$8 sps:$4 sm:$0xff]   ;;  %v3049_v46 = vld [vmem:[#allocation2 + $0x164] ss:$8 sps:$4 sm:$0xff]  }
  0x60   : > { %2290 = vmatprep.subr.bf16.mxu0 %v2289_v9  ;;  %2376 = vmatpush1.bf16.msra.mxu1 %v3036_v32  ;;  %v3054_v48 = vld [vmem:[#allocation2 + $0x160] ss:$8 sps:$4 sm:$0xff]   ;;  %v3035_v49 = vld [vmem:[#allocation2 + $0x50] ss:$8 sps:$4 sm:$0xff]   ;;  %v3039_v51 = vld [vmem:[#allocation2 + $0x64] ss:$8 sps:$4 sm:$0xff]   ;;  %p3382_p3 = pneg %p3381_p2 }
  0x61   : > { %2378 = vmatprep.subr.bf16.mxu1 %v3037_v34  ;;  %v381_v50 = vld [vmem:[%s3886_s1 + $0x60] sm:$0xff]  ;;  %v3055_v52 = vld [vmem:[#allocation2 + $0x174] ss:$8 sps:$4 sm:$0xff]   ;;  %v382_v53 = vld [vmem:[%s3886_s1 + $0x68] sm:$0xff]  ;;  %s3383_s11 = sshll.u32 %s3457_s23, 4  ;;  %s3384_s11 = int_to_ptr.vmem [resolvable:$false] %s3383_s11 }
  0x62   : > { %v383_v54 = vld [vmem:[%s3886_s1 + $0x70] sm:$0xff]  ;;  %v3041_v56 = vld [vmem:[#allocation2 + $0x60] ss:$8 sps:$4 sm:$0xff]   ;;  %v3061_v58 = vld [vmem:[#allocation2 + $0x184] ss:$8 sps:$4 sm:$0xff]   ;;  %s3385_s15 = scalar_lea.vmem %s3384_s11, 2048  ;;  %p3386_p4 = scmp.lt.s32.totalorder %s3833_s21, %s3384_s11 }
  0x63   : > { %2292 = vmatpush3.bf16.msra.mxu0 %v2289_v9  ;;  %v3060_v55 = vld [vmem:[#allocation2 + $0x170] ss:$8 sps:$4 sm:$0xff]   ;;  %v3045_v57 = vld [vmem:[#allocation2 + $0x74] ss:$8 sps:$4 sm:$0xff]   ;;  %v3051_v61 = vld [vmem:[#allocation2 + $0x84] ss:$8 sps:$4 sm:$0xff]   ;;  %p3387_p7 = scmp.lt.s32.totalorder %s3385_s15, %s3379_s25 }
  0x64   : > { %2294 = vmatprep.subr.bf16.mxu0 %v2293_v12  ;;  %2380 = vmatpush1.bf16.msra.mxu1 %v3042_v37  ;;  %v384_v59 = vld [vmem:[%s3886_s1 + $0x78] sm:$0xff]  ;;  %v3066_v62 = vld [vmem:[#allocation2 + $0x180] ss:$8 sps:$4 sm:$0xff]   ;;  %v387_v5 = vld [vmem:[%s3886_s1 + $0x90] sm:$0xff] }
  0x65   : > { %2382 = vmatprep.subr.bf16.mxu1 %v3043_v40  ;;  %v3047_v60 = vld [vmem:[#allocation2 + $0x70] ss:$8 sps:$4 sm:$0xff]   ;;  %v385_v63 = vld [vmem:[%s3886_s1 + $0x80] sm:$0xff]  ;;  %v3067_v0 = vld [vmem:[#allocation2 + $0x194] ss:$8 sps:$4 sm:$0xff]   ;;  %p3388_p8 = por %p3387_p7, %p3386_p4 }
  0x66   : > { %v3053_v1 = vld [vmem:[#allocation2 + $0x80] ss:$8 sps:$4 sm:$0xff]   ;;  %v3072_v3 = vld [vmem:[#allocation2 + $0x190] ss:$8 sps:$4 sm:$0xff]   ;;  %v3057_v4 = vld [vmem:[#allocation2 + $0x94] ss:$8 sps:$4 sm:$0xff]  }
  0x67   : > { %2296 = vmatpush3.bf16.msra.mxu0 %v2293_v12  ;;  %v386_v2 = vld [vmem:[%s3886_s1 + $0x88] sm:$0xff]  ;;  %v3059_v8 = vld [vmem:[#allocation2 + $0x90] ss:$8 sps:$4 sm:$0xff]   ;;  %v3079_v10 = vld [vmem:[#allocation2 + $0x1b4] ss:$8 sps:$4 sm:$0xff]   ;;  %p3389_p11 = pnand %p3388_p8, %p3382_p3 }
  0x68   : > { %2298 = vmatprep.subr.bf16.mxu0 %v3007_v14  ;;  %2384 = vmatpush1.bf16.msra.mxu1 %v3048_v44  ;;  %v3073_v6 = vld [vmem:[#allocation2 + $0x1a4] ss:$8 sps:$4 sm:$0xff]   ;;  %v3078_v7 = vld [vmem:[#allocation2 + $0x1a0] ss:$8 sps:$4 sm:$0xff]   ;;  %v388_v9 = vld [vmem:[%s3886_s1 + $0x98] sm:$0xff] }
  0x69   : > { %2386 = vmatprep.subr.bf16.mxu1 %v3049_v46  ;;  %v3063_v11 = vld [vmem:[#allocation2 + $0xa4] ss:$8 sps:$4 sm:$0xff]   ;;  %v3084_v12 = vld [vmem:[#allocation2 + $0x1b0] ss:$8 sps:$4 sm:$0xff]   ;;  %v3065_v13 = vld [vmem:[#allocation2 + $0xa0] ss:$8 sps:$4 sm:$0xff]  }
  0x6a   : > { %2236 = vmatmul.mubr.msk.f32.vlgmr.msra.gmra.mrb[0].mxu0 %vm389_vm0, %v370_v16  ;;  %v3085_v14 = vld [vmem:[#allocation2 + $0x1c4] ss:$8 sps:$4 sm:$0xff]   ;;  %v3069_v15 = vld [vmem:[#allocation2 + $0xb4] ss:$8 sps:$4 sm:$0xff]   ;;  %v3090_v16 = vld [vmem:[#allocation2 + $0x1c0] ss:$8 sps:$4 sm:$0xff]  }
  0x6b   : > { %2238 = vmatprep.mubr.msk.f32.mxu0 %vm389_vm0, %v371_v18  ;;  %2300 = vmatpush1.bf16.msra.mxu0 %v3009_v19  ;;  %v3071_v17 = vld [vmem:[#allocation2 + $0xb0] ss:$8 sps:$4 sm:$0xff]   ;;  %v3075_v18 = vld [vmem:[#allocation2 + $0xc4] ss:$8 sps:$4 sm:$0xff]   ;;  %v3077_v19 = vld [vmem:[#allocation2 + $0xc0] ss:$8 sps:$4 sm:$0xff]  }
  0x6c   : > { %2302 = vmatprep.subr.bf16.mxu0 %v3010_v21  ;;  %2388 = vmatpush1.bf16.msra.mxu1 %v3054_v48  ;;  %v3081_v20 = vld [vmem:[#allocation2 + $0xd4] ss:$8 sps:$4 sm:$0xff]   ;;  %v3083_v21 = vld [vmem:[#allocation2 + $0xd0] ss:$8 sps:$4 sm:$0xff]   ;;  %v3087_v22 = vld [vmem:[#allocation2 + $0xe4] ss:$8 sps:$4 sm:$0xff]  }
  0x6d   : > { %2390 = vmatprep.subr.bf16.mxu1 %v3055_v52  ;;  %v3093_v25 = vld [vmem:[#allocation2 + $0xf4] ss:$8 sps:$4 sm:$0xff]   ;;  %v3097_v28 = vld [vmem:[#allocation2 + $0x1e4] ss:$8 sps:$4 sm:$0xff]   ;;  %v3105_v40 = vld [vmem:[#allocation2 + $0x200] ss:$8 sps:$4 sm:$0xff]  }
  0x6e   : > { %2239 = vmatmul.mubr.msk.f32.gmra.mrb[2].mxu0 %vm389_vm0, %v372_v23  ;;  %v3089_v23 = vld [vmem:[#allocation2 + $0xe0] ss:$8 sps:$4 sm:$0xff]   ;;  %v3103_v32 = vld [vmem:[#allocation2 + $0x204] ss:$8 sps:$4 sm:$0xff]  }
  0x6f   : > { %2241 = vmatprep.mubr.msk.f32.mxu0 %vm389_vm0, %v373_v24  ;;  %2304 = vmatpush1.bf16.msra.mxu0 %v3012_v26  ;;  %v3091_v24 = vld [vmem:[#allocation2 + $0x1d4] ss:$8 sps:$4 sm:$0xff]   ;;  %v3095_v26 = vld [vmem:[#allocation2 + $0xf0] ss:$8 sps:$4 sm:$0xff]  }
  0x70   : > { %2306 = vmatprep.subr.bf16.mxu0 %v3015_v27  ;;  %2392 = vmatpush1.bf16.msra.mxu1 %v3060_v55  ;;  %v3096_v27 = vld [vmem:[#allocation2 + $0x1d0] ss:$8 sps:$4 sm:$0xff]   ;;  %v3117_v55 = vld [vmem:[#allocation2 + $0x240] ss:$8 sps:$4 sm:$0xff]  }
  0x71   : > { %2394 = vmatprep.subr.bf16.mxu1 %v3061_v58 }
  0x72   : > { %2242 = vmatmul.mubr.msk.f32.gmra.mrb[4].mxu0 %vm389_vm0, %v374_v29  ;;  %v3099_v29 = vld [vmem:[#allocation2 + $0x1e0] ss:$8 sps:$4 sm:$0xff]  }
  0x73   : > { %2244 = vmatprep.mubr.msk.f32.mxu0 %vm389_vm0, %v375_v30  ;;  %2308 = vmatpush1.bf16.msra.mxu0 %v3017_v31  ;;  %v3100_v30 = vld [vmem:[#allocation2 + $0x1f4] ss:$8 sps:$4 sm:$0xff]   ;;  %v3102_v31 = vld [vmem:[#allocation2 + $0x1f0] ss:$8 sps:$4 sm:$0xff]  }
  0x74   : > { %2310 = vmatprep.subr.bf16.mxu0 %v3021_v33  ;;  %2396 = vmatpush1.bf16.msra.mxu1 %v3066_v62  ;;  %v3124_v62 = vld [vmem:[#allocation2 + $0x274] ss:$8 sps:$4 sm:$0xff]  }
  0x75   : > { %2398 = vmatprep.subr.bf16.mxu1 %v3067_v0  ;;  %v3127_v0 = vld [vmem:[#allocation2 + $0x284] ss:$8 sps:$4 sm:$0xff]  }
  0x76   : > { %2245 = vmatmul.mubr.msk.f32.gmra.mrb[6].mxu0 %vm389_vm0, %v376_v35 }
  0x77   : > { %2247 = vmatprep.mubr.msk.f32.mxu0 %vm389_vm0, %v377_v36  ;;  %2312 = vmatpush1.bf16.msra.mxu0 %v3023_v38 }
  0x78   : > { %2314 = vmatprep.subr.bf16.mxu0 %v3027_v39  ;;  %2400 = vmatpush1.bf16.msra.mxu1 %v3072_v3  ;;  %v3132_v3 = vld [vmem:[#allocation2 + $0x290] ss:$8 sps:$4 sm:$0xff]  }
  0x79   : > { %2402 = vmatprep.subr.bf16.mxu1 %v3073_v6  ;;  %v3136_v6 = vld [vmem:[#allocation2 + $0x2b4] ss:$8 sps:$4 sm:$0xff]  }
  0x7a   : > { %2248 = vmatmul.mubr.msk.f32.gmra.mrb[8].mxu0 %vm389_vm0, %v378_v41 }
  0x7b   : > { %2250 = vmatprep.mubr.msk.f32.mxu0 %vm389_vm0, %v379_v42  ;;  %2316 = vmatpush1.bf16.msra.mxu0 %v3029_v43  ;;  %v3106_v42 = vld [vmem:[#allocation2 + $0x214] ss:$8 sps:$4 sm:$0xff]   ;;  %v3108_v43 = vld [vmem:[#allocation2 + $0x210] ss:$8 sps:$4 sm:$0xff]  }
  0x7c   : > { %2318 = vmatprep.subr.bf16.mxu0 %v3033_v45  ;;  %2404 = vmatpush1.bf16.msra.mxu1 %v3078_v7  ;;  %v3109_v45 = vld [vmem:[#allocation2 + $0x224] ss:$8 sps:$4 sm:$0xff]   ;;  %v3138_v7 = vld [vmem:[#allocation2 + $0x2b0] ss:$8 sps:$4 sm:$0xff]  }
  0x7d   : > { %2406 = vmatprep.subr.bf16.mxu1 %v3079_v10  ;;  %v3142_v10 = vld [vmem:[#allocation2 + $0x2d4] ss:$8 sps:$4 sm:$0xff]  }
  0x7e   : > { %2251 = vmatmul.mubr.msk.f32.gmra.mrb[10].mxu0 %vm389_vm0, %v380_v47  ;;  %v3111_v47 = vld [vmem:[#allocation2 + $0x220] ss:$8 sps:$4 sm:$0xff]  }
  0x7f   : > { %2253 = vmatprep.mubr.msk.f32.mxu0 %vm389_vm0, %v381_v50  ;;  %2320 = vmatpush1.bf16.msra.mxu0 %v3035_v49  ;;  %v3112_v49 = vld [vmem:[#allocation2 + $0x234] ss:$8 sps:$4 sm:$0xff]  }
  0x80   : > { %2322 = vmatprep.subr.bf16.mxu0 %v3039_v51  ;;  %2408 = vmatpush1.bf16.msra.mxu1 %v3084_v12  ;;  %v3114_v51 = vld [vmem:[#allocation2 + $0x230] ss:$8 sps:$4 sm:$0xff]   ;;  %v3145_v12 = vld [vmem:[#allocation2 + $0x2e4] ss:$8 sps:$4 sm:$0xff]  }
  0x81   : > { %2410 = vmatprep.subr.bf16.mxu1 %v3085_v14 }
  0x82   : > { %2254 = vmatmul.mubr.msk.f32.gmra.mrb[12].mxu0 %vm389_vm0, %v382_v53  ;;  %v3115_v53 = vld [vmem:[#allocation2 + $0x244] ss:$8 sps:$4 sm:$0xff]  }
  0x83   : > { %2256 = vmatprep.mubr.msk.f32.mxu0 %vm389_vm0, %v383_v54  ;;  %2324 = vmatpush1.bf16.msra.mxu0 %v3041_v56 }
  0x84   : > { %2326 = vmatprep.subr.bf16.mxu0 %v3045_v57  ;;  %2412 = vmatpush1.bf16.msra.mxu1 %v3090_v16  ;;  %v3118_v57 = vld [vmem:[#allocation2 + $0x254] ss:$8 sps:$4 sm:$0xff]  }
  0x85   : > { %2414 = vmatprep.subr.bf16.mxu1 %v3091_v24  ;;  %v3157_v24 = vld [vmem:[#allocation2 + $0x324] ss:$8 sps:$4 sm:$0xff]  }
  0x86   : > { %2257 = vmatmul.mubr.msk.f32.gmra.mrb[14].mxu0 %vm389_vm0, %v384_v59  ;;  %v3120_v59 = vld [vmem:[#allocation2 + $0x250] ss:$8 sps:$4 sm:$0xff]  }
  0x87   : > { %2328 = vmatpush1.bf16.msra.mxu0 %v3047_v60  ;;  %2259 = vmatprep.mubr.msk.f32.mxu0 %vm389_vm0, %v385_v63  ;;  %v3121_v60 = vld [vmem:[#allocation2 + $0x264] ss:$8 sps:$4 sm:$0xff]   ;;  %v3126_v63 = vld [vmem:[#allocation2 + $0x270] ss:$8 sps:$4 sm:$0xff]  }
  0x88   : > { %2330 = vmatprep.subr.bf16.mxu0 %v3051_v61  ;;  %2416 = vmatpush1.bf16.msra.mxu1 %v3096_v27  ;;  %v3123_v61 = vld [vmem:[#allocation2 + $0x260] ss:$8 sps:$4 sm:$0xff]   ;;  %v3162_v27 = vld [vmem:[#allocation2 + $0x330] ss:$8 sps:$4 sm:$0xff]  }
  0x89   : > { %2418 = vmatprep.subr.bf16.mxu1 %v3097_v28  ;;  %v3163_v28 = vld [vmem:[#allocation2 + $0x344] ss:$8 sps:$4 sm:$0xff]  }
  0x8a   : > { %2260 = vmatmul.mubr.msk.f32.gmra.mrb[16].mxu0 %vm389_vm0, %v386_v2  ;;  %v3130_v2 = vld [vmem:[#allocation2 + $0x294] ss:$8 sps:$4 sm:$0xff]  }
  0x8b   : > { %2332 = vmatpush1.bf16.msra.mxu0 %v3053_v1  ;;  %2262 = vmatprep.mubr.msk.f32.mxu0 %vm389_vm0, %v387_v5  ;;  %v3129_v1 = vld [vmem:[#allocation2 + $0x280] ss:$8 sps:$4 sm:$0xff]  }
  0x8c   : > { %2334 = vmatprep.subr.bf16.mxu0 %v3057_v4  ;;  %2420 = vmatpush1.bf16.msra.mxu1 %v3099_v29  ;;  %v3133_v4 = vld [vmem:[#allocation2 + $0x2a4] ss:$8 sps:$4 sm:$0xff]   ;;  %v3135_v5 = vld [vmem:[#allocation2 + $0x2a0] ss:$8 sps:$4 sm:$0xff]  }
  0x8d   : > { %2422 = vmatprep.subr.bf16.mxu1 %v3100_v30  ;;  %v3165_v29 = vld [vmem:[#allocation2 + $0x340] ss:$8 sps:$4 sm:$0xff]   ;;  %v3166_v30 = vld [vmem:[#allocation2 + $0x354] ss:$8 sps:$4 sm:$0xff]  }
  0x8e   : > { %2263 = vmatmul.mubr.msk.f32.gmra.mrb[18].mxu0 %vm389_vm0, %v388_v9  ;;  %v3141_v9 = vld [vmem:[#allocation2 + $0x2c0] ss:$8 sps:$4 sm:$0xff]  }
  0x8f   : > { %2336 = vmatpush1.bf16.msra.mxu0 %v3059_v8  ;;  %v3139_v8 = vld [vmem:[#allocation2 + $0x2c4] ss:$8 sps:$4 sm:$0xff]  }
  0x90   : > { %2338 = vmatprep.subr.bf16.mxu0 %v3063_v11  ;;  %2424 = vmatpush1.bf16.msra.mxu1 %v3102_v31  ;;  %v3144_v11 = vld [vmem:[#allocation2 + $0x2d0] ss:$8 sps:$4 sm:$0xff]  }
  0x91   : > { %2426 = vmatprep.subr.bf16.mxu1 %v3103_v32  ;;  %v3247_v31 = vld [vmem:[#allocation5 + $0x4] ss:$12 sps:$4 sm:$0xff]   ;;  %v3249_v32 = vld [vmem:[#allocation5] ss:$12 sps:$4 sm:$0xff]  }
  0x93   : > { %2340 = vmatpush1.bf16.msra.mxu0 %v3065_v13  ;;  %v3147_v13 = vld [vmem:[#allocation2 + $0x2e0] ss:$8 sps:$4 sm:$0xff]  }
  0x94   : > { %2342 = vmatprep.subr.bf16.mxu0 %v3069_v15  ;;  %v3148_v15 = vld [vmem:[#allocation2 + $0x2f4] ss:$8 sps:$4 sm:$0xff]  }
  0x97   : > { %2344 = vmatpush1.bf16.msra.mxu0 %v3071_v17  ;;  %v3150_v17 = vld [vmem:[#allocation2 + $0x2f0] ss:$8 sps:$4 sm:$0xff]  }
  0x98   : > { %2346 = vmatprep.subr.bf16.mxu0 %v3075_v18 }
  0x9b   : > { %2348 = vmatpush1.bf16.msra.mxu0 %v3077_v19  ;;  %v3151_v19 = vld [vmem:[#allocation2 + $0x304] ss:$8 sps:$4 sm:$0xff]  }
  0x9c   : > { %2350 = vmatprep.subr.bf16.mxu0 %v3081_v20 }
  0x9f   : > { %2352 = vmatpush1.bf16.msra.mxu0 %v3083_v21  ;;  %v3153_v21 = vld [vmem:[#allocation2 + $0x300] ss:$8 sps:$4 sm:$0xff]  }
  0xa0   : > { %2354 = vmatprep.subr.bf16.mxu0 %v3087_v22  ;;  %v3154_v22 = vld [vmem:[#allocation2 + $0x314] ss:$8 sps:$4 sm:$0xff]  }
  0xa3   : > { %2356 = vmatpush1.bf16.msra.mxu0 %v3089_v23  ;;  %v3156_v23 = vld [vmem:[#allocation2 + $0x310] ss:$8 sps:$4 sm:$0xff]  }
  0xa4   : > { %2358 = vmatprep.subr.bf16.mxu0 %v3093_v25  ;;  %v3159_v25 = vld [vmem:[#allocation2 + $0x320] ss:$8 sps:$4 sm:$0xff]  }
  0xa7   : > { %2360 = vmatpush1.bf16.msra.mxu0 %v3095_v26  ;;  %v3160_v26 = vld [vmem:[#allocation2 + $0x334] ss:$8 sps:$4 sm:$0xff]  }
  0xa8   : > { %2618 = vmatprep.subr.bf16.mxu0 %v3247_v31  ;;  %v3211_v31 = vld [vmem:[#allocation2 + $0x444] ss:$8 sps:$4 sm:$0xff]  }
 0x13d   : > { %v2237_v33 = vpop.f32.mrb[0].mxu0 }
 0x13e   : > { %v516_v34 = vpop.f32.mrb[1].mxu0 }
 0x141   : > { %v2240_v35 = vpop.f32.mrb[2].mxu0 }
 0x142   : > { %v526_v36 = vpop.f32.mrb[3].mxu0 }
 0x143   : > { %1159 = vmatprep.mubr.f32.mxu0 %v526_v36  ;;  %v3252_v36 = vld [vmem:[#allocation5 + $0x18] ss:$12 sps:$4 sm:$0xff]  }
 0x144   : > { %1160 = vmatmul.mubr.f32.vlgmr.msra.gmra.mrb[20].mxu0 %v516_v34  ;;  %v3168_v34 = vld [vmem:[#allocation2 + $0x350] ss:$8 sps:$4 sm:$0xff]  }
 0x145   : > { %v2243_v37 = vpop.f32.mrb[4].mxu0  ;;  %1165 = vmatprep.mubr.f32.mxu0 %v2240_v35  ;;  %v3169_v35 = vld [vmem:[#allocation2 + $0x364] ss:$8 sps:$4 sm:$0xff]   ;;  %2620 = vmatpush1.bf16.msra.mxu0 %v3249_v32  ;;  %v3213_v32 = vld [vmem:[#allocation2 + $0x440] ss:$8 sps:$4 sm:$0xff]  }
 0x146   : > { %v536_v38 = vpop.f32.mrb[5].mxu0 }
 0x148   : > { %1166 = vmatmul.mubr.f32.gmra.mrb[22].mxu0 %v2237_v33  ;;  %v3250_v33 = vld [vmem:[#allocation5 + $0x1c] ss:$12 sps:$4 sm:$0xff]  }
 0x149   : > { %v2246_v39 = vpop.f32.mrb[6].mxu0  ;;  %2622 = vmatprep.subr.bf16.mxu0 %v3250_v33  ;;  %v3216_v33 = vld [vmem:[#allocation2 + $0x450] ss:$8 sps:$4 sm:$0xff]  }
 0x14a   : > { %v546_v41 = vpop.f32.mrb[7].mxu0  ;;  %2624 = vmatpush1.bf16.msra.mxu0 %v3252_v36  ;;  %v3222_v36 = vld [vmem:[#allocation2 + $0x470] ss:$8 sps:$4 sm:$0xff]  }
 0x14b   : > { %1236 = vmatprep.mubr.f32.mxu1 %v546_v41  ;;  %v3256_v41 = vld [vmem:[#allocation5 + $0x4c] ss:$12 sps:$4 sm:$0xff]  }
 0x14c   : > { %1237 = vmatmul.mubr.f32.vlgmr.msra.gmra.mrb[0].mxu1 %v536_v38  ;;  %v3171_v38 = vld [vmem:[#allocation2 + $0x360] ss:$8 sps:$4 sm:$0xff]  }
 0x14d   : > { %2428 = vmatpush1.bf16.msra.mxu1 %v3105_v40  ;;  %1242 = vmatprep.mubr.f32.mxu1 %v2246_v39  ;;  %v3725_v44 = vpop.f32.mrb[8].mxu0  ;;  %v3172_v39 = vld [vmem:[#allocation2 + $0x374] ss:$8 sps:$4 sm:$0xff]  }
 0x14e   : > { %2430 = vmatprep.subr.bf16.mxu1 %v3106_v42  ;;  %v3727_v46 = vpop.f32.mrb[9].mxu0  ;;  %v3255_v40 = vld [vmem:[#allocation5 + $0x30] ss:$12 sps:$4 sm:$0xff]  }
 0x14f   : > { %v3174_v42 = vld [vmem:[#allocation2 + $0x370] ss:$8 sps:$4 sm:$0xff]  }
 0x150   : > { %1243 = vmatmul.mubr.f32.gmra.mrb[2].mxu1 %v2243_v37  ;;  %v3253_v37 = vld [vmem:[#allocation5 + $0x34] ss:$12 sps:$4 sm:$0xff]  }
 0x151   : > { %2432 = vmatpush1.bf16.msra.mxu1 %v3108_v43  ;;  %v3729_v48 = vpop.f32.mrb[10].mxu0  ;;  %2626 = vmatprep.subr.bf16.mxu0 %v3253_v37  ;;  %v3175_v43 = vld [vmem:[#allocation2 + $0x384] ss:$8 sps:$4 sm:$0xff]  }
 0x152   : > { %2434 = vmatprep.subr.bf16.mxu1 %v3109_v45  ;;  %v566_v50 = vpop.f32.mrb[11].mxu0  ;;  %2628 = vmatpush1.bf16.msra.mxu0 %v3255_v40  ;;  %v3259_v45 = vld [vmem:[#allocation5 + $0x64] ss:$12 sps:$4 sm:$0xff]  }
 0x153   : > { %1313 = vmatprep.mubr.f32.mxu1 %v566_v50  ;;  %2630 = vmatprep.subr.bf16.mxu0 %v3256_v41  ;;  %v3180_v50 = vld [vmem:[#allocation2 + $0x390] ss:$8 sps:$4 sm:$0xff]   ;;  %v3223_v37 = vld [vmem:[#allocation2 + $0x484] ss:$8 sps:$4 sm:$0xff]  }
 0x154   : > { %v3228_v40 = vld [vmem:[#allocation2 + $0x490] ss:$8 sps:$4 sm:$0xff]   ;;  %v3229_v41 = vld [vmem:[#allocation2 + $0x4a4] ss:$8 sps:$4 sm:$0xff]  }
 0x155   : > { %2436 = vmatpush1.bf16.msra.mxu1 %v3111_v47  ;;  %v3731_v52 = vpop.f32.mrb[12].mxu0  ;;  %v3178_v47 = vld [vmem:[#allocation2 + $0x394] ss:$8 sps:$4 sm:$0xff]  }
 0x156   : > { %2438 = vmatprep.subr.bf16.mxu1 %v3112_v49  ;;  %v3733_v54 = vpop.f32.mrb[13].mxu0  ;;  %v3262_v49 = vld [vmem:[#allocation5 + $0x7c] ss:$12 sps:$4 sm:$0xff]  }
 0x159   : > { %2440 = vmatpush1.bf16.msra.mxu1 %v3114_v51  ;;  %v3735_v56 = vpop.f32.mrb[14].mxu0  ;;  %v3181_v51 = vld [vmem:[#allocation2 + $0x3a4] ss:$8 sps:$4 sm:$0xff]  }
 0x15a   : > { %2442 = vmatprep.subr.bf16.mxu1 %v3115_v53  ;;  %v586_v58 = vpop.f32.mrb[15].mxu0  ;;  %v3264_v53 = vld [vmem:[#allocation5 + $0x78] ss:$12 sps:$4 sm:$0xff]  }
 0x15d   : > { %2444 = vmatpush1.bf16.msra.mxu1 %v3117_v55  ;;  %v3737_v14 = vpop.f32.mrb[16].mxu0  ;;  %v3265_v55 = vld [vmem:[#allocation5 + $0x94] ss:$12 sps:$4 sm:$0xff]  }
 0x15e   : > { %2446 = vmatprep.subr.bf16.mxu1 %v3118_v57  ;;  %v3739_v16 = vpop.f32.mrb[17].mxu0  ;;  %v3183_v57 = vld [vmem:[#allocation2 + $0x3a0] ss:$8 sps:$4 sm:$0xff]  }
 0x161   : > { %2448 = vmatpush1.bf16.msra.mxu1 %v3120_v59  ;;  %v3741_v18 = vpop.f32.mrb[18].mxu0  ;;  %v3267_v59 = vld [vmem:[#allocation5 + $0x90] ss:$12 sps:$4 sm:$0xff]  }
 0x162   : > { %2450 = vmatprep.subr.bf16.mxu1 %v3121_v60  ;;  %v3743_v20 = vpop.f32.mrb[19].mxu0  ;;  %v3268_v60 = vld [vmem:[#allocation5 + $0xac] ss:$12 sps:$4 sm:$0xff]  }
 0x165   : > { %2452 = vmatpush1.bf16.msra.mxu1 %v3123_v61  ;;  %v3186_v61 = vld [vmem:[#allocation2 + $0x3b0] ss:$8 sps:$4 sm:$0xff]  }
 0x166   : > { %2454 = vmatprep.subr.bf16.mxu1 %v3124_v62  ;;  %v3187_v62 = vld [vmem:[#allocation2 + $0x3c4] ss:$8 sps:$4 sm:$0xff]  }
 0x169   : > { %2456 = vmatpush1.bf16.msra.mxu1 %v3126_v63  ;;  %v3270_v63 = vld [vmem:[#allocation5 + $0xa8] ss:$12 sps:$4 sm:$0xff]  }
 0x16a   : > { %2458 = vmatprep.subr.bf16.mxu1 %v3127_v0  ;;  %v3271_v0 = vld [vmem:[#allocation5 + $0xc4] ss:$12 sps:$4 sm:$0xff]  }
 0x16d   : > { %2460 = vmatpush1.bf16.msra.mxu1 %v3129_v1  ;;  %v3189_v1 = vld [vmem:[#allocation2 + $0x3c0] ss:$8 sps:$4 sm:$0xff]  }
 0x16e   : > { %2462 = vmatprep.subr.bf16.mxu1 %v3130_v2  ;;  %v3190_v2 = vld [vmem:[#allocation2 + $0x3d4] ss:$8 sps:$4 sm:$0xff]  }
 0x171   : > { %2464 = vmatpush1.bf16.msra.mxu1 %v3132_v3  ;;  %v3273_v3 = vld [vmem:[#allocation5 + $0xc0] ss:$12 sps:$4 sm:$0xff]  }
 0x172   : > { %2466 = vmatprep.subr.bf16.mxu1 %v3133_v4  ;;  %v3274_v4 = vld [vmem:[#allocation5 + $0xdc] ss:$12 sps:$4 sm:$0xff]  }
 0x175   : > { %2468 = vmatpush1.bf16.msra.mxu1 %v3135_v5  ;;  %v3192_v5 = vld [vmem:[#allocation2 + $0x3d0] ss:$8 sps:$4 sm:$0xff]  }
 0x176   : > { %2470 = vmatprep.subr.bf16.mxu1 %v3136_v6  ;;  %v3193_v6 = vld [vmem:[#allocation2 + $0x3e4] ss:$8 sps:$4 sm:$0xff]  }
 0x179   : > { %2472 = vmatpush1.bf16.msra.mxu1 %v3138_v7  ;;  %v3276_v7 = vld [vmem:[#allocation5 + $0xd8] ss:$12 sps:$4 sm:$0xff]  }
 0x17a   : > { %2474 = vmatprep.subr.bf16.mxu1 %v3139_v8  ;;  %v3277_v8 = vld [vmem:[#allocation5 + $0xf4] ss:$12 sps:$4 sm:$0xff]  }
 0x17d   : > { %2476 = vmatpush1.bf16.msra.mxu1 %v3141_v9  ;;  %v3195_v9 = vld [vmem:[#allocation2 + $0x3e0] ss:$8 sps:$4 sm:$0xff]  }
 0x17e   : > { %2478 = vmatprep.subr.bf16.mxu1 %v3142_v10  ;;  %v3196_v10 = vld [vmem:[#allocation2 + $0x3f4] ss:$8 sps:$4 sm:$0xff]  }
 0x181   : > { %2480 = vmatpush1.bf16.msra.mxu1 %v3144_v11  ;;  %v3279_v11 = vld [vmem:[#allocation5 + $0xf0] ss:$12 sps:$4 sm:$0xff]  }
 0x182   : > { %2482 = vmatprep.subr.bf16.mxu1 %v3145_v12  ;;  %v3280_v12 = vld [vmem:[#allocation5 + $0x10c] ss:$12 sps:$4 sm:$0xff]  }
 0x185   : > { %2484 = vmatpush1.bf16.msra.mxu1 %v3147_v13  ;;  %v3198_v13 = vld [vmem:[#allocation2 + $0x3f0] ss:$8 sps:$4 sm:$0xff]  }
 0x186   : > { %2486 = vmatprep.subr.bf16.mxu1 %v3148_v15  ;;  %v3199_v15 = vld [vmem:[#allocation2 + $0x404] ss:$8 sps:$4 sm:$0xff]  }
 0x189   : > { %2488 = vmatpush1.bf16.msra.mxu1 %v3150_v17  ;;  %v3282_v17 = vld [vmem:[#allocation5 + $0x108] ss:$12 sps:$4 sm:$0xff]  }
 0x18a   : > { %2490 = vmatprep.subr.bf16.mxu1 %v3151_v19  ;;  %v3283_v19 = vld [vmem:[#allocation5 + $0x124] ss:$12 sps:$4 sm:$0xff]  }
 0x18c   : > { %1314 = vmatmul.mubr.f32.vlgmr.msra.gmra.mrb[0].mxu1 %v3727_v46  ;;  %v3177_v46 = vld [vmem:[#allocation2 + $0x380] ss:$8 sps:$4 sm:$0xff]  }
 0x18d   : > { %1319 = vmatprep.mubr.f32.mxu1 %v3729_v48  ;;  %2492 = vmatpush1.bf16.msra.mxu1 %v3153_v21  ;;  %v3261_v48 = vld [vmem:[#allocation5 + $0x60] ss:$12 sps:$4 sm:$0xff]  }
 0x18e   : > { %2494 = vmatprep.subr.bf16.mxu1 %v3154_v22  ;;  %v3201_v21 = vld [vmem:[#allocation2 + $0x400] ss:$8 sps:$4 sm:$0xff]   ;;  %v3202_v22 = vld [vmem:[#allocation2 + $0x414] ss:$8 sps:$4 sm:$0xff]  }
 0x190   : > { %1320 = vmatmul.mubr.f32.gmra.mrb[2].mxu1 %v3725_v44  ;;  %v3258_v44 = vld [vmem:[#allocation5 + $0x48] ss:$12 sps:$4 sm:$0xff]  }
 0x191   : > { %2496 = vmatpush1.bf16.msra.mxu1 %v3156_v23  ;;  %1390 = vmatprep.mubr.f32.mxu1 %v586_v58  ;;  %v3184_v58 = vld [vmem:[#allocation2 + $0x3b4] ss:$8 sps:$4 sm:$0xff]   ;;  %v3285_v23 = vld [vmem:[#allocation5 + $0x120] ss:$12 sps:$4 sm:$0xff]  }
 0x192   : > { %2498 = vmatprep.subr.bf16.mxu1 %v3157_v24  ;;  %2632 = vmatpush1.bf16.msra.mxu0 %v3258_v44  ;;  %v3286_v24 = vld [vmem:[#allocation5 + $0x13c] ss:$12 sps:$4 sm:$0xff]   ;;  %v3234_v44 = vld [vmem:[#allocation2 + $0x4b0] ss:$8 sps:$4 sm:$0xff]  }
 0x193   : > { %2634 = vmatprep.subr.bf16.mxu0 %v3259_v45  ;;  %v3235_v45 = vld [vmem:[#allocation2 + $0x4c4] ss:$8 sps:$4 sm:$0xff]  }
 0x195   : > { %2500 = vmatpush1.bf16.msra.mxu1 %v3159_v25  ;;  %v3204_v25 = vld [vmem:[#allocation2 + $0x410] ss:$8 sps:$4 sm:$0xff]  }
 0x196   : > { %2502 = vmatprep.subr.bf16.mxu1 %v3160_v26  ;;  %2636 = vmatpush1.bf16.msra.mxu0 %v3261_v48  ;;  %v3205_v26 = vld [vmem:[#allocation2 + $0x424] ss:$8 sps:$4 sm:$0xff]   ;;  %v3240_v48 = vld [vmem:[#allocation2 + $0x4d0] ss:$8 sps:$4 sm:$0xff]  }
 0x197   : > { %2638 = vmatprep.subr.bf16.mxu0 %v3262_v49  ;;  %v3241_v49 = vld [vmem:[#allocation2 + $0x4e4] ss:$8 sps:$4 sm:$0xff]  }
 0x199   : > { %2504 = vmatpush1.bf16.msra.mxu1 %v3162_v27  ;;  %v3288_v27 = vld [vmem:[#allocation5 + $0x138] ss:$12 sps:$4 sm:$0xff]  }
 0x19a   : > { %2506 = vmatprep.subr.bf16.mxu1 %v3163_v28  ;;  %2640 = vmatpush1.bf16.msra.mxu0 %v3264_v53  ;;  %v3289_v28 = vld [vmem:[#allocation5 + $0x154] ss:$12 sps:$4 sm:$0xff]   ;;  %v3246_v53 = vld [vmem:[#allocation2 + $0x4f0] ss:$8 sps:$4 sm:$0xff]  }
 0x19b   : > { %2642 = vmatprep.subr.bf16.mxu0 %v3265_v55 }
 0x19d   : > { %2508 = vmatpush1.bf16.msra.mxu1 %v3165_v29  ;;  %v3207_v29 = vld [vmem:[#allocation2 + $0x420] ss:$8 sps:$4 sm:$0xff]  }
 0x19e   : > { %2510 = vmatprep.subr.bf16.mxu1 %v3166_v30  ;;  %2644 = vmatpush1.bf16.msra.mxu0 %v3267_v59  ;;  %v3291_v30 = vld [vmem:[#allocation5 + $0x150] ss:$12 sps:$4 sm:$0xff]  }
 0x19f   : > { %2646 = vmatprep.subr.bf16.mxu0 %v3268_v60  ;;  %v3292_v60 = vld [vmem:[#allocation5 + $0x16c] ss:$12 sps:$4 sm:$0xff]  }
 0x1a1   : > { %2512 = vmatpush1.bf16.msra.mxu1 %v3168_v34  ;;  %v3217_v34 = vld [vmem:[#allocation2 + $0x464] ss:$8 sps:$4 sm:$0xff]  }
 0x1a2   : > { %2514 = vmatprep.subr.bf16.mxu1 %v3169_v35  ;;  %2648 = vmatpush1.bf16.msra.mxu0 %v3270_v63  ;;  %v3220_v35 = vld [vmem:[#allocation2 + $0x474] ss:$8 sps:$4 sm:$0xff]  }
 0x1a3   : > { %2650 = vmatprep.subr.bf16.mxu0 %v3271_v0 }
 0x1a5   : > { %2516 = vmatpush1.bf16.msra.mxu1 %v3171_v38  ;;  %v3225_v38 = vld [vmem:[#allocation2 + $0x480] ss:$8 sps:$4 sm:$0xff]  }
 0x1a6   : > { %2518 = vmatprep.subr.bf16.mxu1 %v3172_v39  ;;  %2652 = vmatpush1.bf16.msra.mxu0 %v3273_v3  ;;  %v3226_v39 = vld [vmem:[#allocation2 + $0x494] ss:$8 sps:$4 sm:$0xff]  }
 0x1a7   : > { %2654 = vmatprep.subr.bf16.mxu0 %v3274_v4  ;;  %v3296_v3 = vld [vmem:[#allocation5 + $0x8] ss:$12 sps:$4 sm:$0xff]  }
 0x1a9   : > { %2520 = vmatpush1.bf16.msra.mxu1 %v3174_v42  ;;  %v3231_v42 = vld [vmem:[#allocation2 + $0x4a0] ss:$8 sps:$4 sm:$0xff]  }
 0x1aa   : > { %2522 = vmatprep.subr.bf16.mxu1 %v3175_v43  ;;  %2656 = vmatpush1.bf16.msra.mxu0 %v3276_v7  ;;  %v3232_v43 = vld [vmem:[#allocation2 + $0x4b4] ss:$8 sps:$4 sm:$0xff]   ;;  %v3299_v7 = vld [vmem:[#allocation5 + $0xf8] ss:$12 sps:$4 sm:$0xff]  }
 0x1ab   : > { %2658 = vmatprep.subr.bf16.mxu0 %v3277_v8  ;;  %v3300_v8 = vld [vmem:[#allocation5 + $0x38] ss:$12 sps:$4 sm:$0xff]  }
 0x1ad   : > { %2524 = vmatpush1.bf16.msra.mxu1 %v3177_v46  ;;  %v3237_v46 = vld [vmem:[#allocation2 + $0x4c0] ss:$8 sps:$4 sm:$0xff]  }
 0x1ae   : > { %2526 = vmatprep.subr.bf16.mxu1 %v3178_v47  ;;  %2660 = vmatpush1.bf16.msra.mxu0 %v3279_v11  ;;  %v3238_v47 = vld [vmem:[#allocation2 + $0x4d4] ss:$8 sps:$4 sm:$0xff]  }
 0x1af   : > { %2662 = vmatprep.subr.bf16.mxu0 %v3280_v12  ;;  %v3303_v11 = vld [vmem:[#allocation5 + $0x128] ss:$12 sps:$4 sm:$0xff]  }
 0x1b0   : > { %v3304_v12 = vld [vmem:[#allocation5 + $0x68] ss:$12 sps:$4 sm:$0xff]  }
 0x1b1   : > { %2528 = vmatpush1.bf16.msra.mxu1 %v3180_v50  ;;  %v3243_v50 = vld [vmem:[#allocation2 + $0x4e0] ss:$8 sps:$4 sm:$0xff]  }
 0x1b2   : > { %2530 = vmatprep.subr.bf16.mxu1 %v3181_v51  ;;  %2664 = vmatpush1.bf16.msra.mxu0 %v3282_v17  ;;  %v3244_v51 = vld [vmem:[#allocation2 + $0x4f4] ss:$8 sps:$4 sm:$0xff]   ;;  %v3307_v17 = vld [vmem:[#allocation5 + $0x158] ss:$12 sps:$4 sm:$0xff]  }
 0x1b3   : > { %2666 = vmatprep.subr.bf16.mxu0 %v3283_v19  ;;  %v3308_v19 = vld [vmem:[#allocation5 + $0x98] ss:$12 sps:$4 sm:$0xff]  }
 0x1b5   : > { %2532 = vmatpush1.bf16.msra.mxu1 %v3183_v57 }
 0x1b6   : > { %2534 = vmatprep.subr.bf16.mxu1 %v3184_v58  ;;  %2668 = vmatpush1.bf16.msra.mxu0 %v3285_v23  ;;  %v1792_v23 = vld [vmem:[%s3890_s5] sm:$0xff] }
 0x1b7   : > { %2670 = vmatprep.subr.bf16.mxu0 %v3286_v24  ;;  %v1793_v24 = vld [vmem:[%s3890_s5 + $0x8] sm:$0xff] }
 0x1b9   : > { %2536 = vmatpush1.bf16.msra.mxu1 %v3186_v61  ;;  %v3294_v61 = vld [vmem:[#allocation5 + $0x168] ss:$12 sps:$4 sm:$0xff]  }
 0x1ba   : > { %2538 = vmatprep.subr.bf16.mxu1 %v3187_v62  ;;  %2672 = vmatpush1.bf16.msra.mxu0 %v3288_v27  ;;  %v3295_v62 = vld [vmem:[#allocation5 + $0xc8] ss:$12 sps:$4 sm:$0xff]  }
 0x1bb   : > { %2674 = vmatprep.subr.bf16.mxu0 %v3289_v28 }
 0x1bd   : > { %2540 = vmatpush1.bf16.msra.mxu1 %v3189_v1 }
 0x1be   : > { %2542 = vmatprep.subr.bf16.mxu1 %v3190_v2  ;;  %2676 = vmatpush1.bf16.msra.mxu0 %v3291_v30 }
 0x1bf   : > { %2678 = vmatprep.subr.bf16.mxu0 %v3292_v60 }
 0x1c1   : > { %2544 = vmatpush1.bf16.msra.mxu1 %v3192_v5 }
 0x1c2   : > { %2546 = vmatprep.subr.bf16.mxu1 %v3193_v6  ;;  %2680 = vmatpush1.bf16.msra.mxu0 %v3294_v61  ;;  %v3298_v6 = vld [vmem:[#allocation5 + $0x20] ss:$12 sps:$4 sm:$0xff]  }
 0x1c3   : > { %2682 = vmatprep.subr.bf16.mxu0 %v3295_v62  ;;  %v1845_v62 = vld [vmem:[%s3893_s8] sm:$0xff] }
 0x1c5   : > { %2548 = vmatpush1.bf16.msra.mxu1 %v3195_v9  ;;  %v3301_v9 = vld [vmem:[#allocation5 + $0x110] ss:$12 sps:$4 sm:$0xff]  }
 0x1c6   : > { %2550 = vmatprep.subr.bf16.mxu1 %v3196_v10  ;;  %v3302_v10 = vld [vmem:[#allocation5 + $0x50] ss:$12 sps:$4 sm:$0xff]  }
 0x1c9   : > { %2552 = vmatpush1.bf16.msra.mxu1 %v3198_v13  ;;  %v3305_v13 = vld [vmem:[#allocation5 + $0x140] ss:$12 sps:$4 sm:$0xff]  }
 0x1ca   : > { %2554 = vmatprep.subr.bf16.mxu1 %v3199_v15  ;;  %v3306_v15 = vld [vmem:[#allocation5 + $0x80] ss:$12 sps:$4 sm:$0xff]  }
 0x1cc   : > { %1391 = vmatmul.mubr.f32.vlgmr.msra.gmra.mrb[0].mxu1 %v3733_v54  ;;  %v3208_v54 = vld [vmem:[#allocation2 + $0x434] ss:$8 sps:$4 sm:$0xff]  }
 0x1cd   : > { %1396 = vmatprep.mubr.f32.mxu1 %v3735_v56  ;;  %2556 = vmatpush1.bf16.msra.mxu1 %v3201_v21  ;;  %v3210_v56 = vld [vmem:[#allocation2 + $0x430] ss:$8 sps:$4 sm:$0xff]  }
 0x1ce   : > { %2558 = vmatprep.subr.bf16.mxu1 %v3202_v22  ;;  %v3309_v21 = vld [vmem:[#allocation5 + $0x170] ss:$12 sps:$4 sm:$0xff]  }
 0x1cf   : > { %v3310_v22 = vld [vmem:[#allocation5 + $0xb0] ss:$12 sps:$4 sm:$0xff]  }
 0x1d0   : > { %1397 = vmatmul.mubr.f32.gmra.mrb[2].mxu1 %v3731_v52  ;;  %v3214_v52 = vld [vmem:[#allocation2 + $0x454] ss:$8 sps:$4 sm:$0xff]  }
 0x1d1   : > { %2560 = vmatpush1.bf16.msra.mxu1 %v3204_v25  ;;  %1467 = vmatprep.mubr.f32.mxu1 %v3743_v20  ;;  %v3219_v20 = vld [vmem:[#allocation2 + $0x460] ss:$8 sps:$4 sm:$0xff]  }
 0x1d2   : > { %2562 = vmatprep.subr.bf16.mxu1 %v3205_v26 }
 0x1d5   : > { %2564 = vmatpush1.bf16.msra.mxu1 %v3207_v29  ;;  %v1795_v29 = vld [vmem:[%s3890_s5 + $0x18] sm:$0xff] }
 0x1d6   : > { %2566 = vmatprep.subr.bf16.mxu1 %v3208_v54  ;;  %v1796_v54 = vld [vmem:[%s3890_s5 + $0x20] sm:$0xff] }
 0x1d9   : > { %2568 = vmatpush1.bf16.msra.mxu1 %v3210_v56 }
 0x1da   : > { %2570 = vmatprep.subr.bf16.mxu1 %v3211_v31 }
 0x1dd   : > { %2572 = vmatpush1.bf16.msra.mxu1 %v3213_v32 }
 0x1de   : > { %2574 = vmatprep.subr.bf16.mxu1 %v3214_v52 }
 0x1e1   : > { %2576 = vmatpush1.bf16.msra.mxu1 %v3216_v33 }
 0x1e2   : > { %2578 = vmatprep.subr.bf16.mxu1 %v3217_v34 }
 0x1e5   : > { %2580 = vmatpush1.bf16.msra.mxu1 %v3219_v20 }
 0x1e6   : > { %2582 = vmatprep.subr.bf16.mxu1 %v3220_v35  ;;  %v1794_v35 = vld [vmem:[%s3890_s5 + $0x10] sm:$0xff] }
 0x1e9   : > { %2584 = vmatpush1.bf16.msra.mxu1 %v3222_v36 }
 0x1ea   : > { %2586 = vmatprep.subr.bf16.mxu1 %v3223_v37 }
 0x1ed   : > { %2588 = vmatpush1.bf16.msra.mxu1 %v3225_v38 }
 0x1ee   : > { %2590 = vmatprep.subr.bf16.mxu1 %v3226_v39 }
 0x1f1   : > { %2592 = vmatpush1.bf16.msra.mxu1 %v3228_v40  ;;  %v1797_v40 = vld [vmem:[%s3890_s5 + $0x28] sm:$0xff] }
 0x1f2   : > { %2594 = vmatprep.subr.bf16.mxu1 %v3229_v41  ;;  %v1808_v41 = vld [vmem:[%s3889_s4] sm:$0xff] }
 0x1f5   : > { %2596 = vmatpush1.bf16.msra.mxu1 %v3231_v42 }
 0x1f6   : > { %2598 = vmatprep.subr.bf16.mxu1 %v3232_v43 }
 0x1f9   : > { %2600 = vmatpush1.bf16.msra.mxu1 %v3234_v44 }
 0x1fa   : > { %2602 = vmatprep.subr.bf16.mxu1 %v3235_v45 }
 0x1fd   : > { %2604 = vmatpush1.bf16.msra.mxu1 %v3237_v46  ;;  %v1809_v46 = vld [vmem:[%s3889_s4 + $0x8] sm:$0xff] }
 0x1fe   : > { %2606 = vmatprep.subr.bf16.mxu1 %v3238_v47 }
 0x201   : > { %2608 = vmatpush1.bf16.msra.mxu1 %v3240_v48 }
 0x202   : > { %2610 = vmatprep.subr.bf16.mxu1 %v3241_v49 }
 0x205   : > { %2612 = vmatpush1.bf16.msra.mxu1 %v3243_v50 }
 0x206   : > { %2614 = vmatprep.subr.bf16.mxu1 %v3244_v51 }
 0x209   : > { %2616 = vmatpush1.bf16.msra.mxu1 %v3246_v53 }
 0x20c   : > { %1468 = vmatmul.mubr.f32.vlgmr.msra.gmra.mrb[0].mxu1 %v3739_v16  ;;  %v3297_v16 = vld [vmem:[#allocation5 + $0xe0] ss:$12 sps:$4 sm:$0xff]  }
 0x20d   : > { %1473 = vmatprep.mubr.f32.mxu1 %v3741_v18 }
 0x210   : > { %1474 = vmatmul.mubr.f32.gmra.mrb[2].mxu1 %v3737_v14 }
 0x217   : > { %v1161_v55 = vpop.f32.mrb[20].mxu0 }
 0x218   : > { %v1163_v57 = vpop.f32.mrb[21].mxu0 }
 0x21b   : > { %v1167_v58 = vpop.f32.mrb[22].mxu0 }
 0x21c   : > { %v1169_v59 = vpop.f32.mrb[23].mxu0 }
 0x2df   : > { %v1469_v63 = vpop.f32.mrb[0].mxu1 }
 0x2e0   : > { %v2717_v0 = vadd.f32 %v1469_v63, %v1161_v55  ;;  %v1471_v1 = vpop.f32.mrb[1].mxu1 }
 0x2e1   : > { %v2718_v2 = vadd.f32 %v1471_v1, %v1163_v57 }
 0x2e3   : > { %v1475_v4 = vpop.f32.mrb[2].mxu1  ;;  %1704 = vmatprep.mubr.f32.mxu0 %v2718_v2 }
 0x2e4   : > { %v2719_v18 = vadd.f32 %v1475_v4, %v1167_v58  ;;  %v1477_v14 = vpop.f32.mrb[3].mxu1  ;;  %1705 = vmatmul.mubr.f32.vlgmr.msra.gmra.mrb[24].mxu0 %v2717_v0 }
 0x2e5   : > { %v2720_v5 = vadd.f32 %v1477_v14, %v1169_v59  ;;  %2684 = vmatpush3.bf16.msra.mxu0 %v3296_v3  ;;  %v1837_v14 = vld [vmem:[%s3891_s6] sm:$0xff] }
 0x2e6   : > { %2686 = vmatprep.subr.bf16.mxu0 %v3297_v16 }
 0x2e7   : > { %1710 = vmatprep.mubr.f32.mxu0 %v2720_v5 }
 0x2e8   : > { %1711 = vmatmul.mubr.f32.gmra.mrb[26].mxu0 %v2719_v18 }
 0x2e9   : > { %2688 = vmatpush3.bf16.msra.mxu0 %v3298_v6  ;;  %1781 = vmatprep.mubr.f32.mxu0 %v2718_v2  ;;  %v1838_v6 = vld [vmem:[%s3891_s6 + $0x8] sm:$0xff] }
 0x2ea   : > { %2690 = vmatprep.subr.bf16.mxu0 %v3299_v7 }
 0x2ed   : > { %2692 = vmatpush3.bf16.msra.mxu0 %v3300_v8 }
 0x2ee   : > { %2694 = vmatprep.subr.bf16.mxu0 %v3301_v9  ;;  %v1841_v9 = vld [vmem:[%s3892_s7] sm:$0xff] }
 0x2f1   : > { %2696 = vmatpush3.bf16.msra.mxu0 %v3302_v10  ;;  %v1842_v10 = vld [vmem:[%s3892_s7 + $0x8] sm:$0xff] }
 0x2f2   : > { %2698 = vmatprep.subr.bf16.mxu0 %v3303_v11 }
 0x2f5   : > { %2700 = vmatpush3.bf16.msra.mxu0 %v3304_v12 }
 0x2f6   : > { %2702 = vmatprep.subr.bf16.mxu0 %v3305_v13 }
 0x2f9   : > { %2704 = vmatpush3.bf16.msra.mxu0 %v3306_v15 }
 0x2fa   : > { %2706 = vmatprep.subr.bf16.mxu0 %v3307_v17  ;;  %v1846_v17 = vld [vmem:[%s3893_s8 + $0x8] sm:$0xff] }
 0x2fd   : > { %2708 = vmatpush3.bf16.msra.mxu0 %v3308_v19  ;;  %v1847_v19 = vld [vmem:[%s3893_s8 + $0x10] sm:$0xff] }
 0x2fe   : > { %2710 = vmatprep.subr.bf16.mxu0 %v3309_v21  ;;  %v1848_v21 = vld [vmem:[%s3893_s8 + $0x18] sm:$0xff] }
 0x301   : > { %2712 = vmatpush3.bf16.msra.mxu0 %v3310_v22  ;;  %v1849_v22 = vld [vmem:[%s3893_s8 + $0x20] sm:$0xff] }
 0x304   : > { %1782 = vmatmul.mubr.f32.vlgmr.msra.gmra.mrb[28].mxu0 %v2717_v0 }
 0x305   : > { %1786 = vmatprep.mubr.f32.mxu0 %v2720_v5 }
 0x308   : > { %1787 = vmatmul.mubr.f32.gmra.mrb[30].mxu0 %v2719_v18 }
 0x309   : > { %2269 = vmatprep.mubr.msk.f32.mxu0 %vm1853_vm1, %v1845_v62 }
 0x3b7   : > { %v1706_v25 = vpop.f32.mrb[24].mxu0 }
 0x3b8   : > { %v1798_v26 = vmul.f32 %v1792_v23, %v1706_v25  ;;  %v1708_v27 = vpop.f32.mrb[25].mxu0  ;;  %v1850_v23 = vld [vmem:[%s3893_s8 + $0x28] sm:$0xff]  ;;  %v1852_v25 = vld [vmem:[%s3893_s8 + $0x38] sm:$0xff] }
 0x3b9   : > { %v1799_v28 = vmul.f32 %v1793_v24, %v1708_v27  ;;  %v1851_v24 = vld [vmem:[%s3893_s8 + $0x30] sm:$0xff]  ;;  %v3315_v27 = vld [vmem:[%s3635_s29 + $0x8] sm:$0xff] }
 0x3bb   : > { %v1804_v30 = vadd.f32 %v1799_v28, %v1798_v26  ;;  %v1712_v56 = vpop.f32.mrb[26].mxu0 }
 0x3bc   : > { %v1801_v31 = vmul.f32 %v1795_v29, %v1712_v56  ;;  %v1714_v32 = vpop.f32.mrb[27].mxu0 }
 0x3bd   : > { %v1802_v52 = vmul.f32 %v1796_v54, %v1714_v32  ;;  %v3316_v54 = vld [vmem:[%s3635_s29] sm:$0xff] }
 0x3bf   : > { %v1805_v33 = vadd.f32 %v1802_v52, %v1801_v31  ;;  %v3317_v31 = vld [vmem:[%s3635_s29 + $0x18] sm:$0xff] }
 0x3d7   : > { %v2203_v34 = vpop.f32.mrb[28].mxu0 }
 0x3d8   : > { %v2204_v20 = vpop.f32.mrb[29].mxu0 }
 0x3d9   : > { %v2205_v36 = vadd.f32 %v2204_v20, %v2203_v34 }
 0x3db   : > { %v1800_v37 = vmul.f32 %v2205_v36, %v1794_v35  ;;  %v2206_v38 = vpop.f32.mrb[30].mxu0  ;;  %v3319_v35 = vld [vmem:[%s3635_s29 + $0x28] sm:$0xff] }
 0x3dc   : > { %v2207_v39 = vpop.f32.mrb[31].mxu0 }
 0x3dd   : > { %v2208_v42 = vadd.f32 %v2207_v39, %v2206_v38  ;;  %v1806_v43 = vadd.f32 %v1804_v30, %v1800_v37  ;;  %v3320_v38 = vld [vmem:[%s3635_s29 + $0x20] sm:$0xff] }
 0x3df   : > { %v1803_v44 = vmul.f32 %v2208_v42, %v1797_v40  ;;  %v1810_v45 = vadd.f32 %v1808_v41, %v1806_v43  ;;  %v3321_v41 = vld [vmem:[%s3635_s29 + $0x38] sm:$0xff] }
 0x3e1   : > { %v1812_v47 = vmax.f32 %v1810_v45, 0.0  ;;  %v1807_v48 = vadd.f32 %v1805_v33, %v1803_v44  ;;  %v3318_v33 = vld [vmem:[%s3635_s29 + $0x10] sm:$0xff] }
 0x3e2   : > { %v3322_v44 = vld [vmem:[%s3635_s29 + $0x30] sm:$0xff] }
 0x3e3   : > { %1814 = vadd.xlane.f32.xlu0 %v1812_v47  ;;  %v1811_v49 = vadd.f32 %v1809_v46, %v1807_v48 }
 0x3e5   : > { %v1813_v50 = vmax.f32 %v1811_v49, 0.0 }
 0x3e7   : > { %1816 = vadd.xlane.f32.xlu0 %v1813_v50 }
 0x470   : > { %v1815_v51 = vpop.xlane.xlu0 %1814 }
 0x471   : > { %v1819_v53 = vmul.f32 0.0078125, %v1815_v51 }
 0x473   : > { %v1821_v55 = vsub.f32 %v1812_v47, %v1819_v53 }
 0x474   : > { %v1817_v57 = vpop.xlane.xlu0 %1816 }
 0x475   : > { %v1820_v58 = vmul.f32 0.0078125, %v1817_v57  ;;  %v1823_v59 = vmul.f32 %v1821_v55, %v1821_v55 }
 0x477   : > { %v1822_v60 = vsub.f32 %v1813_v50, %v1820_v58  ;;  %1825 = vadd.xlane.f32.xlu1 %v1823_v59 }
 0x479   : > { %v1824_v61 = vmul.f32 %v1822_v60, %v1822_v60 }
 0x47b   : > { %1827 = vadd.xlane.f32.xlu1 %v1824_v61 }
 0x504   : > { %v1826_v63 = vpop.xlane.xlu1 %1825 }
 0x505   : > { %v1829_v0 = vmul.f32 0.0078125, %v1826_v63 }
 0x507   : > { %v1831_v1 = vadd.f32 1e-05, %v1829_v0 }
 0x508   : > { %v1828_v2 = vpop.xlane.xlu1 %1827 }
 0x509   : > { %3311 = vrsqrt.f32 %v1831_v1  ;;  %v1830_v3 = vmul.f32 0.0078125, %v1828_v2 }
 0x50b   : > { %v1832_v16 = vadd.f32 1e-05, %v1830_v3 }
 0x50d   : > { %3313 = vrsqrt.f32 %v1832_v16 }
 0x513   : > { %v3312_v4 = vpop.eup %3311 }
 0x514   : > { %v1835_v18 = vmul.f32 %v3312_v4, %v1821_v55 }
 0x516   : > { %v1839_v8 = vmul.f32 %v1837_v14, %v1835_v18 }
 0x517   : > { %v3314_v5 = vpop.eup %3313 }
 0x518   : > { %v1836_v7 = vmul.f32 %v3314_v5, %v1822_v60  ;;  %v1843_v12 = vadd.f32 %v1841_v9, %v1839_v8 }
 0x51a   : > { %v1840_v11 = vmul.f32 %v1838_v6, %v1836_v7 }
 0x51c   : > { %v1844_v13 = vadd.f32 %v1842_v10, %v1840_v11 }
 0x51e   : > { %v2713_v15 = vpack.c.bf16 %v1844_v13, %v1843_v12 }
 0x520   : > { %2714 = vmatprep.subr.bf16.mxu0 %v2713_v15 }
 0x521   : > { %2716 = vmatpush3.bf16.msra.mxu0 %v2713_v15 }
 0x524   : > { %2270 = vmatmul.mubr.msk.f32.vlgmr.msra.gmra.mrb[32].mxu0 %vm1853_vm1, %v1846_v17 }
 0x525   : > { %2272 = vmatprep.mubr.msk.f32.mxu0 %vm1853_vm1, %v1847_v19 }
 0x528   : > { %2273 = vmatmul.mubr.msk.f32.gmra.mrb[34].mxu0 %vm1853_vm1, %v1848_v21 }
 0x529   : > { %2275 = vmatprep.mubr.msk.f32.mxu0 %vm1853_vm1, %v1849_v22 }
 0x52c   : > { %2276 = vmatmul.mubr.msk.f32.gmra.mrb[36].mxu0 %vm1853_vm1, %v1850_v23 }
 0x52d   : > { %2278 = vmatprep.mubr.msk.f32.mxu0 %vm1853_vm1, %v1851_v24 }
 0x530   : > { %2279 = vmatmul.mubr.msk.f32.gmra.mrb[38].mxu0 %vm1853_vm1, %v1852_v25 }
 0x5f7   : > { %v2271_v26 = vpop.f32.mrb[32].mxu0 }
 0x5f8   : > { %v1984_v28 = vadd.f32 %v3315_v27, %v2271_v26  ;;  %v1944_v29 = vpop.f32.mrb[33].mxu0 }
 0x5f9   : > { %v1983_v30 = vadd.f32 %v3316_v54, %v1944_v29 }
 0x5fa   : > { %1992 = vst [vmem:[%s355_s28 + $0x8] sm:$0xff] %v1984_v28 }
 0x5fb   : > { %1991 = vst [vmem:[%s355_s28] sm:$0xff] %v1983_v30  ;;  %v2274_v56 = vpop.f32.mrb[34].mxu0 }
 0x5fc   : > { %v1986_v32 = vadd.f32 %v3317_v31, %v2274_v56  ;;  %v1954_v52 = vpop.f32.mrb[35].mxu0 }
 0x5fd   : > { %v1985_v34 = vadd.f32 %v3318_v33, %v1954_v52 }
 0x5fe   : > { %1994 = vst [vmem:[%s355_s28 + $0x18] sm:$0xff] %v1986_v32 }
 0x5ff   : > { %1993 = vst [vmem:[%s355_s28 + $0x10] sm:$0xff] %v1985_v34  ;;  %v2277_v20 = vpop.f32.mrb[36].mxu0 }
 0x600   : > { %v1988_v36 = vadd.f32 %v3319_v35, %v2277_v20  ;;  %v1964_v37 = vpop.f32.mrb[37].mxu0 }
 0x601   : > { %v1987_v39 = vadd.f32 %v3320_v38, %v1964_v37 }
 0x602   : > { %1996 = vst [vmem:[%s355_s28 + $0x28] sm:$0xff] %v1988_v36 }
 0x603   : > { %1995 = vst [vmem:[%s355_s28 + $0x20] sm:$0xff] %v1987_v39  ;;  %v2280_v40 = vpop.f32.mrb[38].mxu0 }
 0x604   : > { %v1990_v42 = vadd.f32 %v3321_v41, %v2280_v40  ;;  %v1974_v43 = vpop.f32.mrb[39].mxu0 }
 0x605   : > { %v1989_v45 = vadd.f32 %v3322_v44, %v1974_v43 }
 0x606   : > { %1998 = vst [vmem:[%s355_s28 + $0x38] sm:$0xff] %v1990_v42 }
 0x607   : > { %1997 = vst [vmem:[%s355_s28 + $0x30] sm:$0xff] %v1989_v45 }
 0x608   : > { %3392 = shalt.err (!%p3389_p11)
}
 0x609   : > { %s3393_s29 = scalar_lea.hbm %s3839_s22, 1024  ;;  %s3397_s24 = scalar_lea.hbm %s3894_s9, 2048 }
 0x60a   : > { %p3394_p13 = scmp.ne.s32.totalorder %s3839_s22, %s3393_s29  ;;  %p3398_p6 = scmp.lt.u32.totalorder %s3839_s22, %s3894_s9 }
 0x60b   : > { %p3399_p9 = scmp.lt.u32.totalorder %s3397_s24, %s3393_s29  ;;  %p3401_p12 = scmp.lt.u32.totalorder %s3393_s29, %s3839_s22 }
 0x60c   : > { %p3395_p0 = pnand %p3394_p13, %p3913_p1 }
 0x60d   : > { %p3400_p10 = por %p3399_p9, %p3398_p6 }
 0x60e   : > { %p3396_p5 = pneg %p3395_p0 }
 0x60f   : > { %p3402_p2 = por %p3401_p12, %p3400_p10 }
 0x611   : > { %p3403_p3 = pnand %p3402_p2, %p3396_p5 }
 0x613   : > { %3406 = shalt.err (!%p3403_p3)
}
 0x614   : > { %s3458_s14 = smov 128   ;;  %s3459_s16 = smov 8  }
 0x615   : > { %2949 = dma.vmem_to_hbm [thread:$0]  (%p3913_p1), %s3833_s21, 1024, %s3839_s22, %s3844_s13, %s3458_s14, %s3458_s14, %s3459_s16  }
 0x616 PF: > { %p2966_p4 = scmp.ge.s32.totalorder %s3449_s12, 2  ;;  %s2028_s17 = sand.u32 1, %s3437_s30  }
 0x617   : > { %p3914_p7 = scmp.ne.s32.totalorder %s3905_s20, 0  ;;  %s2029_s25 = scalar_lea.sflag [#allocation4], %s2028_s17 }
 0x619   : > { %p2959_p8 = pnand %p2966_p4, %p3914_p7 }
 0x61b   : > { %3432 = dma.done.wait (!%p2959_p8), %s2029_s25, 1024  }
 0x61c   : > { %3434 = vsyncadd (!%p2959_p8), %s2029_s25, 4294966272  ;;  %s3915_s12 = sld [smem:[#allocation12_spill]]  ;;  %s3916_s23 = sld [smem:[#allocation11_spill]] }
 0x61d   : > { %s3917_s11 = sld [smem:[#allocation13_spill]]  ;;  %s3918_s30 = smov %s3441_s10 }
 0x622   : > { %p21_p11 = scmp.ge.s32.totalorder %s3915_s12, 4   ;;  %s3919_s10 = smov %s3916_s23 }
 0x624   :  { %23 = sbr.rel (!%p21_p11) target bundleno = 5 (0x5), region = 100 }
 0x62b   :  { %2034 = vsyncpa [#allocation3], 1 }
 0x62c   :  { %2036 = vsyncpa [#allocation3 + $0x1], 1 }
 0x62d   :  { %2037 = vsyncpa [#allocation6], 1 }
 0x62e   :  { %2038 = vsyncpa [#allocation4], 1 }
 0x62f   :  { %2040 = vsyncpa [#allocation4 + $0x1], 1 }

</bundles_post_ra>
